<compile_context>
chip_gen: v6e
topology: v6e:2x2x1
jax: 0.10.0
libtpu: 0.0.40
codegen_flags: <defaults>
</compile_context>

<pallas_src>
import math

import jax
import jax.numpy as jnp
from jax import lax
from jax.experimental import pallas as pl
from jax.experimental.pallas import tpu as pltpu

B, S, D = 2, 8, 32          # batch, seq_len, d_model
H = 4                       # n_heads
DH = D // H                 # d_head
DFF = 64                    # d_ff
DM2 = D // 2                # mechanism hidden dim
BS = B * S                  # flattened rows
EPS = 1e-5                  # LayerNorm eps (PyTorch default)
NEG_BIG = -1e30             # additive mask for cross-sequence score entries

# ---- VEC (packed row-vector bundle) row layout: shape (48, D) ----
ROW_PT = 0                  # rows 0:BS  -> integration_proj(pos_time_emb) tiled over batch
ROW_BQ = BS + 0
ROW_BK = BS + 1
ROW_BV = BS + 2
ROW_BO = BS + 3
ROW_B5 = BS + 4
ROW_BM1 = BS + 5            # mechanism hidden bias (zero-padded DM2 -> D)
ROW_WM2 = BS + 6            # mechanism second-layer weight as a row (zero-padded)
ROW_BF2 = BS + 7
ROW_G1 = BS + 8
ROW_BE1 = BS + 9
ROW_G2 = BS + 10
ROW_BE2 = BS + 11
ROW_G3 = BS + 12
ROW_BE3 = BS + 13
ROW_BM2 = BS + 14           # mechanism output bias at col 0
ROW_MASK = BS + 16          # rows ROW_MASK:ROW_MASK+BS, cols 0:BS -> additive score bias

# ---- WBIG (packed (in_dim, D) weight bundle) row-block offsets: shape (256, D) ----
OFF_WQ = 0
OFF_WK = D
OFF_WV = 2 * D
OFF_WO = 3 * D
OFF_W5 = 4 * D              # softmax(element_weights)-combined five-elements weight
OFF_WM1 = 5 * D             # mechanism hidden weight (cols DM2:D zero)
OFF_WF2 = 6 * D             # (DFF, D)


def _gelu_exact(v):
    # nn.GELU() default (erf-based, not tanh approximation)
    return 0.5 * v * (1.0 + lax.erf(v * 0.7071067811865476))


def _ln(v, g, b):
    mu = jnp.mean(v, axis=-1, keepdims=True)
    var = jnp.mean((v - mu) ** 2, axis=-1, keepdims=True)
    return (v - mu) * lax.rsqrt(var + EPS) * g + b


def _dot(a, b):
    return jnp.dot(a, b, preferred_element_type=jnp.float32)


def mech_block_kernel(x_ref, wbig_ref, wf1p_ref, vec_ref, y_ref, mech_ref):
    vec = vec_ref[...]                                            # (48, D)

    # --- PositionTimingLayer: x + integration_proj(cat(pos_emb, time_emb)) (precomputed) ---
    x = x_ref[...] + vec[ROW_PT:ROW_PT + BS, :]                   # (BS, D)

    # --- MechanismAttention on norm1(x) ---
    xn1 = _ln(x, vec[ROW_G1:ROW_G1 + 1], vec[ROW_BE1:ROW_BE1 + 1])

    q = _dot(xn1, wbig_ref[OFF_WQ:OFF_WQ + D]) + vec[ROW_BQ:ROW_BQ + 1]
    k = _dot(xn1, wbig_ref[OFF_WK:OFF_WK + D]) + vec[ROW_BK:ROW_BK + 1]
    v = _dot(xn1, wbig_ref[OFF_WV:OFF_WV + D]) + vec[ROW_BV:ROW_BV + 1]

    # mechanism strengths: sigmoid(Linear(GELU(Linear(xn1)))) -> (BS, 1)
    # (wm1 padded DM2->D with zero cols; padded lanes stay exactly 0 through GELU)
    hm = _gelu_exact(_dot(xn1, wbig_ref[OFF_WM1:OFF_WM1 + D]) + vec[ROW_BM1:ROW_BM1 + 1])
    mech = jax.nn.sigmoid(
        jnp.sum(hm * vec[ROW_WM2:ROW_WM2 + 1], axis=-1, keepdims=True)
        + vec[ROW_BM2:ROW_BM2 + 1, 0:1])
    mech_ref[...] = mech

    # Fold 1/sqrt(dh) into q and the key-axis (1 + mech[j]) factor into k:
    #   s[i,j] = (q[i]*scale) . (k[j]*(1+mech[j])) == (q.k^T)/sqrt(dh) * (1+mech[j])
    qs = q * (1.0 / math.sqrt(DH))
    ks = k * (1.0 + mech)

    # Both sequences processed together; additive bias kills cross-sequence pairs.
    attn_bias = vec[ROW_MASK:ROW_MASK + BS, 0:BS]                 # (BS, BS): 0 or -1e30

    attn = jnp.zeros((BS, D), jnp.float32)
    for h in range(H):                                            # static unroll over heads
        cs = slice(h * DH, (h + 1) * DH)
        s = lax.dot_general(qs[:, cs], ks[:, cs], (((1,), (1,)), ((), ())),
                            preferred_element_type=jnp.float32)   # (BS, BS)
        s = s + attn_bias
        s = s - jnp.max(s, axis=-1, keepdims=True)
        p = jnp.exp(s)                                            # masked entries -> 0
        p = p * pl.reciprocal(jnp.sum(p, axis=-1, keepdims=True), approx=True)
        ctx_h = _dot(p, v[:, cs])                                 # (BS, DH)
        attn = attn + _dot(ctx_h, wbig_ref[OFF_WO + h * DH:OFF_WO + (h + 1) * DH])
    x = x + attn + vec[ROW_BO:ROW_BO + 1]                         # residual (dropout = identity)

    # --- Five-elements transform on norm2(x): fused, softmax-weighted combined weight ---
    xn2 = _ln(x, vec[ROW_G2:ROW_G2 + 1], vec[ROW_BE2:ROW_BE2 + 1])
    x = x + _dot(xn2, wbig_ref[OFF_W5:OFF_W5 + D]) + vec[ROW_B5:ROW_B5 + 1]

    # --- Feed-forward on norm3(x) ---
    xn3 = _ln(x, vec[ROW_G3:ROW_G3 + 1], vec[ROW_BE3:ROW_BE3 + 1])
    h1 = _gelu_exact(_dot(xn3, wf1p_ref[0:D]) + wf1p_ref[D:D + 1])
    x = x + _dot(h1, wbig_ref[OFF_WF2:OFF_WF2 + DFF]) + vec[ROW_BF2:ROW_BF2 + 1]

    y_ref[...] = x


@jax.jit
def mechanism_transformer_block(x, params):
    elem_w = jax.nn.softmax(params["element_weights"])            # (5,), also returned

    # -- weight-space precomputation only (no activation pre-scaling) --
    w5c = jnp.einsum("e,eio->io", elem_w, params["w5"])           # (D, D)
    b5c = elem_w @ params["b5"]                                   # (D,)
    pt_add = params["pt_emb"] @ params["w_int"] + params["b_int"] # (S, D)
    pt_tiled = jnp.tile(pt_add, (B, 1))                           # (BS, D)

    wm1_pad = jnp.pad(params["wm1"], ((0, 0), (0, D - DM2)))      # (D, D)
    bm1_pad = jnp.pad(params["bm1"], (0, D - DM2))                # (D,)
    wm2_row = jnp.pad(params["wm2"][:, 0], (0, D - DM2))          # (D,)
    bm2_row = jnp.pad(params["bm2"], (0, D - 1))                  # (D,)

    wbig = jnp.concatenate(
        [params["wq"], params["wk"], params["wv"], params["wo"],
         w5c, wm1_pad, params["wf2"]], axis=0)                    # (6*D + DFF, D) = (256, 32)
    wf1p = jnp.concatenate([params["wf1"], params["bf1"][None, :]], axis=0)   # (D+1, DFF)

    small_rows = jnp.stack(
        [params["bq"], params["bk"], params["bv"], params["bo"],
         b5c, bm1_pad, wm2_row, params["bf2"],
         params["g1"], params["be1"], params["g2"], params["be2"],
         params["g3"], params["be3"], bm2_row,
         jnp.zeros((D,), jnp.float32)], axis=0)                   # (16, D)

    row_b = jnp.arange(BS)[:, None] // S
    col_b = jnp.arange(BS)[None, :] // S
    bias_block = jnp.where(row_b == col_b, 0.0, NEG_BIG).astype(jnp.float32)  # (BS, BS)
    bias_pad = jnp.pad(bias_block, ((0, 0), (0, D - BS)))         # (BS, D)

    vec = jnp.concatenate([pt_tiled, small_rows, bias_pad], axis=0)           # (48, D)

    x_flat = x.reshape(BS, D)
    y_flat, mech_col = pl.pallas_call(
        mech_block_kernel,
        out_shape=(jax.ShapeDtypeStruct((BS, D), jnp.float32),
                   jax.ShapeDtypeStruct((BS, 1), jnp.float32)),
        compiler_params=pltpu.CompilerParams(vmem_limit_bytes=32 * 1024 * 1024),
    )(x_flat, wbig, wf1p, vec)

    return y_flat.reshape(B, S, D), mech_col.reshape(B, S), elem_w


# ----------------------- pure-JAX reference (for in-script validation) -----------------------
def reference_block(x, params):
    elem_w = jax.nn.softmax(params["element_weights"])
    pt_add = params["pt_emb"] @ params["w_int"] + params["b_int"]     # (S, D)
    x = x + pt_add[None]                                              # (B, S, D)

    def ln(v, g, b):
        mu = jnp.mean(v, axis=-1, keepdims=True)
        var = jnp.mean((v - mu) ** 2, axis=-1, keepdims=True)
        return (v - mu) / jnp.sqrt(var + EPS) * g + b

    xn1 = ln(x, params["g1"], params["be1"])
    q = xn1 @ params["wq"] + params["bq"]
    k = xn1 @ params["wk"] + params["bk"]
    v = xn1 @ params["wv"] + params["bv"]
    hm = _gelu_exact(xn1 @ params["wm1"] + params["bm1"])
    mech = jax.nn.sigmoid(hm @ params["wm2"] + params["bm2"])[..., 0]  # (B, S)

    qh = q.reshape(B, S, H, DH).transpose(0, 2, 1, 3)
    kh = k.reshape(B, S, H, DH).transpose(0, 2, 1, 3)
    vh = v.reshape(B, S, H, DH).transpose(0, 2, 1, 3)
    scores = jnp.einsum("bhqd,bhkd->bhqk", qh, kh) / math.sqrt(DH)
    scores = scores * (1.0 + mech[:, None, None, :])
    attn_w = jax.nn.softmax(scores, axis=-1)
    ctx = jnp.einsum("bhqk,bhkd->bhqd", attn_w, vh).transpose(0, 2, 1, 3).reshape(B, S, D)
    x = x + (ctx @ params["wo"] + params["bo"])

    xn2 = ln(x, params["g2"], params["be2"])
    w5c = jnp.einsum("e,eio->io", elem_w, params["w5"])
    b5c = elem_w @ params["b5"]
    x = x + (xn2 @ w5c + b5c)

    xn3 = ln(x, params["g3"], params["be3"])
    h1 = _gelu_exact(xn3 @ params["wf1"] + params["bf1"])
    x = x + (h1 @ params["wf2"] + params["bf2"])
    return x, mech, elem_w


def _linear_params(key, din, dout):
    # torch.nn.Linear default init bounds, deterministic here; stored as (in, out).
    kw, kb = jax.random.split(key)
    bound = 1.0 / math.sqrt(din)
    w = jax.random.uniform(kw, (din, dout), jnp.float32, -bound, bound)
    b = jax.random.uniform(kb, (dout,), jnp.float32, -bound, bound)
    return w, b


def init_params(key):
    keys = jax.random.split(key, 20)
    p = {}

    # PositionTimingLayer sinusoidal tables (only the first S rows are ever used)
    d_half = D // 2
    pos = jnp.arange(S, dtype=jnp.float32)[:, None]
    div_p = jnp.exp(jnp.arange(0, d_half, 2, dtype=jnp.float32) * -(math.log(10000.0) / d_half))
    div_t = jnp.exp(jnp.arange(0, d_half, 2, dtype=jnp.float32) * -(math.log(5000.0) / d_half))
    pos_emb = jnp.zeros((S, d_half), jnp.float32)
    pos_emb = pos_emb.at[:, 0::2].set(jnp.sin(pos * div_p)).at[:, 1::2].set(jnp.cos(pos * div_p))
    time_emb = jnp.zeros((S, d_half), jnp.float32)
    time_emb = time_emb.at[:, 0::2].set(jnp.sin(pos * div_t)).at[:, 1::2].set(jnp.cos(pos * div_t))
    p["pt_emb"] = jnp.concatenate([pos_emb, time_emb], axis=-1)   # (S, D)

    p["w_int"], p["b_int"] = _linear_params(keys[0], D, D)

    # MechanismAttention projections
    p["wq"], p["bq"] = _linear_params(keys[1], D, D)
    p["wk"], p["bk"] = _linear_params(keys[2], D, D)
    p["wv"], p["bv"] = _linear_params(keys[3], D, D)
    p["wo"], p["bo"] = _linear_params(keys[4], D, D)
    p["wm1"], p["bm1"] = _linear_params(keys[5], D, DM2)
    p["wm2"], p["bm2"] = _linear_params(keys[6], DM2, 1)

    # FiveElementsTransformationLayer structured weights (torch stores (out,in); kernel wants W.T)
    I = jnp.eye(D, dtype=jnp.float32)
    wood = 1.2 * I
    fire = I + 0.1 * jax.random.normal(keys[7], (D, D), jnp.float32)
    earth = 0.8 * I
    metal = I * (jax.random.uniform(keys[8], (D, D)) > 0.7).astype(jnp.float32)
    ii = jnp.arange(D)[:, None]
    jj = jnp.arange(D)[None, :]
    water = jnp.where(jnp.abs(ii - jj) <= 1, 1.0 / (jnp.abs(ii - jj) + 1.0), 0.0).astype(jnp.float32)
    p["w5"] = jnp.stack([wood.T, fire.T, earth.T, metal.T, water.T], axis=0)   # (5, in, out)
    p["b5"] = jnp.stack([_linear_params(keys[9 + i], D, D)[1] for i in range(5)], axis=0)  # (5, D)
    p["element_weights"] = jnp.ones((5,), jnp.float32) / 5.0

    # Feed-forward
    p["wf1"], p["bf1"] = _linear_params(keys[14], D, DFF)
    p["wf2"], p["bf2"] = _linear_params(keys[15], DFF, D)

    # LayerNorms (default affine init)
    ones = jnp.ones((D,), jnp.float32)
    zeros = jnp.zeros((D,), jnp.float32)
    p["g1"], p["be1"] = ones, zeros
    p["g2"], p["be2"] = ones, zeros
    p["g3"], p["be3"] = ones, zeros
    return p


if __name__ == "__main__":
    key = jax.random.PRNGKey(0)
    kx, kp = jax.random.split(key)
    x = jax.random.normal(kx, (B, S, D), jnp.float32)
    params = init_params(kp)

    y, mech_strengths, element_weights = mechanism_transformer_block(x, params)
    jax.block_until_ready((y, mech_strengths, element_weights))

    assert y.shape == (B, S, D)
    assert mech_strengths.shape == (B, S)
    assert element_weights.shape == (5,)
    assert bool(jnp.isfinite(y).all()) and bool(jnp.isfinite(mech_strengths).all())

    # Correctness vs. pure-JAX reference (loose tolerance: approx reciprocal in softmax).
    y_ref, mech_ref, ew_ref = reference_block(x, params)
    assert bool(jnp.allclose(y, y_ref, atol=1e-2, rtol=1e-2))
    assert bool(jnp.allclose(mech_strengths, mech_ref, atol=1e-3, rtol=1e-3))
    assert bool(jnp.allclose(element_weights, ew_ref, atol=1e-6, rtol=1e-6))

    print("KERNEL_OK")
</pallas_src>

<mosaic_0001>
module attributes {stable_mosaic.version = 11 : i64} {
  func.func @mech_block_kernel(%arg0: memref<16x32xf32, #tpu.memory_space<vmem>>, %arg1: memref<256x32xf32, #tpu.memory_space<vmem>>, %arg2: memref<33x64xf32, #tpu.memory_space<vmem>>, %arg3: memref<48x32xf32, #tpu.memory_space<vmem>>, %arg4: memref<16x32xf32, #tpu.memory_space<vmem>>, %arg5: memref<16x1xf32, #tpu.memory_space<vmem>>) attributes {dimension_semantics = [], scalar_prefetch = 0 : i64, scratch_operands = 0 : i64, tpu.core_type = #tpu.core_type<tc>} {
    %c0 = arith.constant 0 : index
    %c0_0 = arith.constant 0 : index
    %0 = vector.load %arg3[%c0, %c0_0] : memref<48x32xf32, #tpu.memory_space<vmem>>, vector<48x32xf32>
    %c0_1 = arith.constant 0 : index
    %c0_2 = arith.constant 0 : index
    %1 = vector.load %arg0[%c0_1, %c0_2] : memref<16x32xf32, #tpu.memory_space<vmem>>, vector<16x32xf32>
    %2 = vector.extract_strided_slice %0 {offsets = [0, 0], sizes = [16, 32], strides = [1, 1]} : vector<48x32xf32> to vector<16x32xf32>
    %3 = arith.addf %1, %2 : vector<16x32xf32>
    %4 = vector.extract_strided_slice %0 {offsets = [24, 0], sizes = [1, 32], strides = [1, 1]} : vector<48x32xf32> to vector<1x32xf32>
    %5 = vector.extract_strided_slice %0 {offsets = [25, 0], sizes = [1, 32], strides = [1, 1]} : vector<48x32xf32> to vector<1x32xf32>
    %cst = arith.constant dense<0.000000e+00> : vector<16xf32>
    %6 = vector.multi_reduction <add>, %3, %cst [1] : vector<16x32xf32> to vector<16xf32>
    %7 = vector.shape_cast %6 : vector<16xf32> to vector<16x1xf32>
    %cst_3 = arith.constant 3.200000e+01 : f32
    %8 = vector.broadcast %cst_3 : f32 to vector<16x1xf32>
    %9 = arith.divf %7, %8 : vector<16x1xf32>
    %10 = vector.broadcast %9 : vector<16x1xf32> to vector<16x32xf32>
    %11 = arith.subf %3, %10 : vector<16x32xf32>
    %12 = arith.mulf %11, %11 : vector<16x32xf32>
    %cst_4 = arith.constant dense<0.000000e+00> : vector<16xf32>
    %13 = vector.multi_reduction <add>, %12, %cst_4 [1] : vector<16x32xf32> to vector<16xf32>
    %14 = vector.shape_cast %13 : vector<16xf32> to vector<16x1xf32>
    %cst_5 = arith.constant 3.200000e+01 : f32
    %15 = vector.broadcast %cst_5 : f32 to vector<16x1xf32>
    %16 = arith.divf %14, %15 : vector<16x1xf32>
    %17 = vector.broadcast %9 : vector<16x1xf32> to vector<16x32xf32>
    %18 = arith.subf %3, %17 : vector<16x32xf32>
    %cst_6 = arith.constant 9.99999974E-6 : f32
    %19 = vector.broadcast %cst_6 : f32 to vector<16x1xf32>
    %20 = arith.addf %16, %19 : vector<16x1xf32>
    %21 = math.rsqrt %20 : vector<16x1xf32>
    %22 = vector.broadcast %21 : vector<16x1xf32> to vector<16x32xf32>
    %23 = arith.mulf %18, %22 : vector<16x32xf32>
    %24 = vector.broadcast %4 : vector<1x32xf32> to vector<16x32xf32>
    %25 = arith.mulf %23, %24 : vector<16x32xf32>
    %26 = vector.broadcast %5 : vector<1x32xf32> to vector<16x32xf32>
    %27 = arith.addf %25, %26 : vector<16x32xf32>
    %c0_7 = arith.constant 0 : index
    %c0_8 = arith.constant 0 : index
    %28 = vector.load %arg1[%c0_7, %c0_8] : memref<256x32xf32, #tpu.memory_space<vmem>>, vector<32x32xf32>
    %cst_9 = arith.constant dense<0.000000e+00> : vector<16x32xf32>
    %29 = tpu.matmul %27, %28, %cst_9 {dimension_numbers = #tpu.dot_dimension_numbers<[1], [0], [0], [1], [0, 0, 1, 1], [], []>} : vector<16x32xf32>, vector<32x32xf32>, vector<16x32xf32> -> vector<16x32xf32>
    %30 = vector.extract_strided_slice %0 {offsets = [16, 0], sizes = [1, 32], strides = [1, 1]} : vector<48x32xf32> to vector<1x32xf32>
    %31 = vector.broadcast %30 : vector<1x32xf32> to vector<16x32xf32>
    %32 = arith.addf %29, %31 : vector<16x32xf32>
    %c32 = arith.constant 32 : index
    %c0_10 = arith.constant 0 : index
    %33 = vector.load %arg1[%c32, %c0_10] : memref<256x32xf32, #tpu.memory_space<vmem>>, vector<32x32xf32>
    %cst_11 = arith.constant dense<0.000000e+00> : vector<16x32xf32>
    %34 = tpu.matmul %27, %33, %cst_11 {dimension_numbers = #tpu.dot_dimension_numbers<[1], [0], [0], [1], [0, 0, 1, 1], [], []>} : vector<16x32xf32>, vector<32x32xf32>, vector<16x32xf32> -> vector<16x32xf32>
    %35 = vector.extract_strided_slice %0 {offsets = [17, 0], sizes = [1, 32], strides = [1, 1]} : vector<48x32xf32> to vector<1x32xf32>
    %36 = vector.broadcast %35 : vector<1x32xf32> to vector<16x32xf32>
    %37 = arith.addf %34, %36 : vector<16x32xf32>
    %c64 = arith.constant 64 : index
    %c0_12 = arith.constant 0 : index
    %38 = vector.load %arg1[%c64, %c0_12] : memref<256x32xf32, #tpu.memory_space<vmem>>, vector<32x32xf32>
    %cst_13 = arith.constant dense<0.000000e+00> : vector<16x32xf32>
    %39 = tpu.matmul %27, %38, %cst_13 {dimension_numbers = #tpu.dot_dimension_numbers<[1], [0], [0], [1], [0, 0, 1, 1], [], []>} : vector<16x32xf32>, vector<32x32xf32>, vector<16x32xf32> -> vector<16x32xf32>
    %40 = vector.extract_strided_slice %0 {offsets = [18, 0], sizes = [1, 32], strides = [1, 1]} : vector<48x32xf32> to vector<1x32xf32>
    %41 = vector.broadcast %40 : vector<1x32xf32> to vector<16x32xf32>
    %42 = arith.addf %39, %41 : vector<16x32xf32>
    %c160 = arith.constant 160 : index
    %c0_14 = arith.constant 0 : index
    %43 = vector.load %arg1[%c160, %c0_14] : memref<256x32xf32, #tpu.memory_space<vmem>>, vector<32x32xf32>
    %cst_15 = arith.constant dense<0.000000e+00> : vector<16x32xf32>
    %44 = tpu.matmul %27, %43, %cst_15 {dimension_numbers = #tpu.dot_dimension_numbers<[1], [0], [0], [1], [0, 0, 1, 1], [], []>} : vector<16x32xf32>, vector<32x32xf32>, vector<16x32xf32> -> vector<16x32xf32>
    %45 = vector.extract_strided_slice %0 {offsets = [21, 0], sizes = [1, 32], strides = [1, 1]} : vector<48x32xf32> to vector<1x32xf32>
    %46 = vector.broadcast %45 : vector<1x32xf32> to vector<16x32xf32>
    %47 = arith.addf %44, %46 : vector<16x32xf32>
    %cst_16 = arith.constant 5.000000e-01 : f32
    %48 = vector.broadcast %cst_16 : f32 to vector<16x32xf32>
    %49 = arith.mulf %48, %47 : vector<16x32xf32>
    %cst_17 = arith.constant 0.707106769 : f32
    %50 = vector.broadcast %cst_17 : f32 to vector<16x32xf32>
    %51 = arith.mulf %47, %50 : vector<16x32xf32>
    %52 = math.erf %51 : vector<16x32xf32>
    %cst_18 = arith.constant 1.000000e+00 : f32
    %53 = vector.broadcast %cst_18 : f32 to vector<16x32xf32>
    %54 = arith.addf %53, %52 : vector<16x32xf32>
    %55 = arith.mulf %49, %54 : vector<16x32xf32>
    %56 = vector.extract_strided_slice %0 {offsets = [22, 0], sizes = [1, 32], strides = [1, 1]} : vector<48x32xf32> to vector<1x32xf32>
    %57 = vector.broadcast %56 : vector<1x32xf32> to vector<16x32xf32>
    %58 = arith.mulf %55, %57 : vector<16x32xf32>
    %cst_19 = arith.constant dense<0.000000e+00> : vector<16xf32>
    %59 = vector.multi_reduction <add>, %58, %cst_19 [1] : vector<16x32xf32> to vector<16xf32>
    %60 = vector.shape_cast %59 : vector<16xf32> to vector<16x1xf32>
    %61 = vector.extract_strided_slice %0 {offsets = [30, 0], sizes = [1, 1], strides = [1, 1]} : vector<48x32xf32> to vector<1x1xf32>
    %62 = vector.broadcast %61 : vector<1x1xf32> to vector<16x1xf32>
    %63 = arith.addf %60, %62 : vector<16x1xf32>
    %64 = arith.negf %63 : vector<16x1xf32>
    %65 = math.exp %64 : vector<16x1xf32>
    %cst_20 = arith.constant 1.000000e+00 : f32
    %66 = vector.broadcast %cst_20 : f32 to vector<16x1xf32>
    %67 = arith.addf %66, %65 : vector<16x1xf32>
    %68 = arith.divf %66, %67 : vector<16x1xf32>
    %c0_21 = arith.constant 0 : index
    %c0_22 = arith.constant 0 : index
    %69 = vector.load %arg5[%c0_21, %c0_22] : memref<16x1xf32, #tpu.memory_space<vmem>>, vector<16x1xf32>
    tpu.vector_store %arg5[%c0_21, %c0_22], %68 {strides = array<i32>} : memref<16x1xf32, #tpu.memory_space<vmem>>, vector<16x1xf32>,
    %cst_23 = arith.constant 0.353553385 : f32
    %70 = vector.broadcast %cst_23 : f32 to vector<16x32xf32>
    %71 = arith.mulf %32, %70 : vector<16x32xf32>
    %cst_24 = arith.constant 1.000000e+00 : f32
    %72 = vector.broadcast %cst_24 : f32 to vector<16x1xf32>
    %73 = arith.addf %72, %68 : vector<16x1xf32>
    %74 = vector.broadcast %73 : vector<16x1xf32> to vector<16x32xf32>
    %75 = arith.mulf %37, %74 : vector<16x32xf32>
    %76 = vector.extract_strided_slice %0 {offsets = [32, 0], sizes = [16, 16], strides = [1, 1]} : vector<48x32xf32> to vector<16x16xf32>
    %cst_25 = arith.constant 0.000000e+00 : f32
    %77 = vector.broadcast %cst_25 : f32 to vector<16x32xf32>
    %78 = vector.extract_strided_slice %71 {offsets = [0, 0], sizes = [16, 8], strides = [1, 1]} : vector<16x32xf32> to vector<16x8xf32>
    %79 = vector.extract_strided_slice %75 {offsets = [0, 0], sizes = [16, 8], strides = [1, 1]} : vector<16x32xf32> to vector<16x8xf32>
    %cst_26 = arith.constant dense<0.000000e+00> : vector<16x16xf32>
    %80 = tpu.matmul %78, %79, %cst_26 {dimension_numbers = #tpu.dot_dimension_numbers<[1], [1], [0], [0], [0, 0, 1, 0], [], []>} : vector<16x8xf32>, vector<16x8xf32>, vector<16x16xf32> -> vector<16x16xf32>
    %81 = arith.addf %80, %76 : vector<16x16xf32>
    %cst_27 = arith.constant dense<0xFF800000> : vector<16xf32>
    %82 = vector.multi_reduction <maximumf>, %81, %cst_27 [1] : vector<16x16xf32> to vector<16xf32>
    %83 = vector.shape_cast %82 : vector<16xf32> to vector<16x1xf32>
    %84 = vector.broadcast %83 : vector<16x1xf32> to vector<16x16xf32>
    %85 = arith.subf %81, %84 : vector<16x16xf32>
    %86 = math.exp %85 : vector<16x16xf32>
    %cst_28 = arith.constant dense<0.000000e+00> : vector<16xf32>
    %87 = vector.multi_reduction <add>, %86, %cst_28 [1] : vector<16x16xf32> to vector<16xf32>
    %88 = vector.shape_cast %87 : vector<16xf32> to vector<16x1xf32>
    %89 = tpu.reciprocal %88 {approx = true} : vector<16x1xf32> -> vector<16x1xf32>
    %90 = vector.broadcast %89 : vector<16x1xf32> to vector<16x16xf32>
    %91 = arith.mulf %86, %90 : vector<16x16xf32>
    %92 = vector.extract_strided_slice %42 {offsets = [0, 0], sizes = [16, 8], strides = [1, 1]} : vector<16x32xf32> to vector<16x8xf32>
    %cst_29 = arith.constant dense<0.000000e+00> : vector<16x8xf32>
    %93 = tpu.matmul %91, %92, %cst_29 {dimension_numbers = #tpu.dot_dimension_numbers<[1], [0], [0], [1], [0, 0, 1, 1], [], []>} : vector<16x16xf32>, vector<16x8xf32>, vector<16x8xf32> -> vector<16x8xf32>
    %c96 = arith.constant 96 : index
    %c0_30 = arith.constant 0 : index
    %94 = vector.load %arg1[%c96, %c0_30] : memref<256x32xf32, #tpu.memory_space<vmem>>, vector<8x32xf32>
    %cst_31 = arith.constant dense<0.000000e+00> : vector<16x32xf32>
    %95 = tpu.matmul %93, %94, %cst_31 {dimension_numbers = #tpu.dot_dimension_numbers<[1], [0], [0], [1], [0, 0, 1, 1], [], []>} : vector<16x8xf32>, vector<8x32xf32>, vector<16x32xf32> -> vector<16x32xf32>
    %96 = arith.addf %77, %95 : vector<16x32xf32>
    %97 = vector.extract_strided_slice %71 {offsets = [0, 8], sizes = [16, 8], strides = [1, 1]} : vector<16x32xf32> to vector<16x8xf32>
    %98 = vector.extract_strided_slice %75 {offsets = [0, 8], sizes = [16, 8], strides = [1, 1]} : vector<16x32xf32> to vector<16x8xf32>
    %cst_32 = arith.constant dense<0.000000e+00> : vector<16x16xf32>
    %99 = tpu.matmul %97, %98, %cst_32 {dimension_numbers = #tpu.dot_dimension_numbers<[1], [1], [0], [0], [0, 0, 1, 0], [], []>} : vector<16x8xf32>, vector<16x8xf32>, vector<16x16xf32> -> vector<16x16xf32>
    %100 = arith.addf %99, %76 : vector<16x16xf32>
    %cst_33 = arith.constant dense<0xFF800000> : vector<16xf32>
    %101 = vector.multi_reduction <maximumf>, %100, %cst_33 [1] : vector<16x16xf32> to vector<16xf32>
    %102 = vector.shape_cast %101 : vector<16xf32> to vector<16x1xf32>
    %103 = vector.broadcast %102 : vector<16x1xf32> to vector<16x16xf32>
    %104 = arith.subf %100, %103 : vector<16x16xf32>
    %105 = math.exp %104 : vector<16x16xf32>
    %cst_34 = arith.constant dense<0.000000e+00> : vector<16xf32>
    %106 = vector.multi_reduction <add>, %105, %cst_34 [1] : vector<16x16xf32> to vector<16xf32>
    %107 = vector.shape_cast %106 : vector<16xf32> to vector<16x1xf32>
    %108 = tpu.reciprocal %107 {approx = true} : vector<16x1xf32> -> vector<16x1xf32>
    %109 = vector.broadcast %108 : vector<16x1xf32> to vector<16x16xf32>
    %110 = arith.mulf %105, %109 : vector<16x16xf32>
    %111 = vector.extract_strided_slice %42 {offsets = [0, 8], sizes = [16, 8], strides = [1, 1]} : vector<16x32xf32> to vector<16x8xf32>
    %cst_35 = arith.constant dense<0.000000e+00> : vector<16x8xf32>
    %112 = tpu.matmul %110, %111, %cst_35 {dimension_numbers = #tpu.dot_dimension_numbers<[1], [0], [0], [1], [0, 0, 1, 1], [], []>} : vector<16x16xf32>, vector<16x8xf32>, vector<16x8xf32> -> vector<16x8xf32>
    %c104 = arith.constant 104 : index
    %c0_36 = arith.constant 0 : index
    %113 = vector.load %arg1[%c104, %c0_36] : memref<256x32xf32, #tpu.memory_space<vmem>>, vector<8x32xf32>
    %cst_37 = arith.constant dense<0.000000e+00> : vector<16x32xf32>
    %114 = tpu.matmul %112, %113, %cst_37 {dimension_numbers = #tpu.dot_dimension_numbers<[1], [0], [0], [1], [0, 0, 1, 1], [], []>} : vector<16x8xf32>, vector<8x32xf32>, vector<16x32xf32> -> vector<16x32xf32>
    %115 = arith.addf %96, %114 : vector<16x32xf32>
    %116 = vector.extract_strided_slice %71 {offsets = [0, 16], sizes = [16, 8], strides = [1, 1]} : vector<16x32xf32> to vector<16x8xf32>
    %117 = vector.extract_strided_slice %75 {offsets = [0, 16], sizes = [16, 8], strides = [1, 1]} : vector<16x32xf32> to vector<16x8xf32>
    %cst_38 = arith.constant dense<0.000000e+00> : vector<16x16xf32>
    %118 = tpu.matmul %116, %117, %cst_38 {dimension_numbers = #tpu.dot_dimension_numbers<[1], [1], [0], [0], [0, 0, 1, 0], [], []>} : vector<16x8xf32>, vector<16x8xf32>, vector<16x16xf32> -> vector<16x16xf32>
    %119 = arith.addf %118, %76 : vector<16x16xf32>
    %cst_39 = arith.constant dense<0xFF800000> : vector<16xf32>
    %120 = vector.multi_reduction <maximumf>, %119, %cst_39 [1] : vector<16x16xf32> to vector<16xf32>
    %121 = vector.shape_cast %120 : vector<16xf32> to vector<16x1xf32>
    %122 = vector.broadcast %121 : vector<16x1xf32> to vector<16x16xf32>
    %123 = arith.subf %119, %122 : vector<16x16xf32>
    %124 = math.exp %123 : vector<16x16xf32>
    %cst_40 = arith.constant dense<0.000000e+00> : vector<16xf32>
    %125 = vector.multi_reduction <add>, %124, %cst_40 [1] : vector<16x16xf32> to vector<16xf32>
    %126 = vector.shape_cast %125 : vector<16xf32> to vector<16x1xf32>
    %127 = tpu.reciprocal %126 {approx = true} : vector<16x1xf32> -> vector<16x1xf32>
    %128 = vector.broadcast %127 : vector<16x1xf32> to vector<16x16xf32>
    %129 = arith.mulf %124, %128 : vector<16x16xf32>
    %130 = vector.extract_strided_slice %42 {offsets = [0, 16], sizes = [16, 8], strides = [1, 1]} : vector<16x32xf32> to vector<16x8xf32>
    %cst_41 = arith.constant dense<0.000000e+00> : vector<16x8xf32>
    %131 = tpu.matmul %129, %130, %cst_41 {dimension_numbers = #tpu.dot_dimension_numbers<[1], [0], [0], [1], [0, 0, 1, 1], [], []>} : vector<16x16xf32>, vector<16x8xf32>, vector<16x8xf32> -> vector<16x8xf32>
    %c112 = arith.constant 112 : index
    %c0_42 = arith.constant 0 : index
    %132 = vector.load %arg1[%c112, %c0_42] : memref<256x32xf32, #tpu.memory_space<vmem>>, vector<8x32xf32>
    %cst_43 = arith.constant dense<0.000000e+00> : vector<16x32xf32>
    %133 = tpu.matmul %131, %132, %cst_43 {dimension_numbers = #tpu.dot_dimension_numbers<[1], [0], [0], [1], [0, 0, 1, 1], [], []>} : vector<16x8xf32>, vector<8x32xf32>, vector<16x32xf32> -> vector<16x32xf32>
    %134 = arith.addf %115, %133 : vector<16x32xf32>
    %135 = vector.extract_strided_slice %71 {offsets = [0, 24], sizes = [16, 8], strides = [1, 1]} : vector<16x32xf32> to vector<16x8xf32>
    %136 = vector.extract_strided_slice %75 {offsets = [0, 24], sizes = [16, 8], strides = [1, 1]} : vector<16x32xf32> to vector<16x8xf32>
    %cst_44 = arith.constant dense<0.000000e+00> : vector<16x16xf32>
    %137 = tpu.matmul %135, %136, %cst_44 {dimension_numbers = #tpu.dot_dimension_numbers<[1], [1], [0], [0], [0, 0, 1, 0], [], []>} : vector<16x8xf32>, vector<16x8xf32>, vector<16x16xf32> -> vector<16x16xf32>
    %138 = arith.addf %137, %76 : vector<16x16xf32>
    %cst_45 = arith.constant dense<0xFF800000> : vector<16xf32>
    %139 = vector.multi_reduction <maximumf>, %138, %cst_45 [1] : vector<16x16xf32> to vector<16xf32>
    %140 = vector.shape_cast %139 : vector<16xf32> to vector<16x1xf32>
    %141 = vector.broadcast %140 : vector<16x1xf32> to vector<16x16xf32>
    %142 = arith.subf %138, %141 : vector<16x16xf32>
    %143 = math.exp %142 : vector<16x16xf32>
    %cst_46 = arith.constant dense<0.000000e+00> : vector<16xf32>
    %144 = vector.multi_reduction <add>, %143, %cst_46 [1] : vector<16x16xf32> to vector<16xf32>
    %145 = vector.shape_cast %144 : vector<16xf32> to vector<16x1xf32>
    %146 = tpu.reciprocal %145 {approx = true} : vector<16x1xf32> -> vector<16x1xf32>
    %147 = vector.broadcast %146 : vector<16x1xf32> to vector<16x16xf32>
    %148 = arith.mulf %143, %147 : vector<16x16xf32>
    %149 = vector.extract_strided_slice %42 {offsets = [0, 24], sizes = [16, 8], strides = [1, 1]} : vector<16x32xf32> to vector<16x8xf32>
    %cst_47 = arith.constant dense<0.000000e+00> : vector<16x8xf32>
    %150 = tpu.matmul %148, %149, %cst_47 {dimension_numbers = #tpu.dot_dimension_numbers<[1], [0], [0], [1], [0, 0, 1, 1], [], []>} : vector<16x16xf32>, vector<16x8xf32>, vector<16x8xf32> -> vector<16x8xf32>
    %c120 = arith.constant 120 : index
    %c0_48 = arith.constant 0 : index
    %151 = vector.load %arg1[%c120, %c0_48] : memref<256x32xf32, #tpu.memory_space<vmem>>, vector<8x32xf32>
    %cst_49 = arith.constant dense<0.000000e+00> : vector<16x32xf32>
    %152 = tpu.matmul %150, %151, %cst_49 {dimension_numbers = #tpu.dot_dimension_numbers<[1], [0], [0], [1], [0, 0, 1, 1], [], []>} : vector<16x8xf32>, vector<8x32xf32>, vector<16x32xf32> -> vector<16x32xf32>
    %153 = arith.addf %134, %152 : vector<16x32xf32>
    %154 = arith.addf %3, %153 : vector<16x32xf32>
    %155 = vector.extract_strided_slice %0 {offsets = [19, 0], sizes = [1, 32], strides = [1, 1]} : vector<48x32xf32> to vector<1x32xf32>
    %156 = vector.broadcast %155 : vector<1x32xf32> to vector<16x32xf32>
    %157 = arith.addf %154, %156 : vector<16x32xf32>
    %158 = vector.extract_strided_slice %0 {offsets = [26, 0], sizes = [1, 32], strides = [1, 1]} : vector<48x32xf32> to vector<1x32xf32>
    %159 = vector.extract_strided_slice %0 {offsets = [27, 0], sizes = [1, 32], strides = [1, 1]} : vector<48x32xf32> to vector<1x32xf32>
    %cst_50 = arith.constant dense<0.000000e+00> : vector<16xf32>
    %160 = vector.multi_reduction <add>, %157, %cst_50 [1] : vector<16x32xf32> to vector<16xf32>
    %161 = vector.shape_cast %160 : vector<16xf32> to vector<16x1xf32>
    %cst_51 = arith.constant 3.200000e+01 : f32
    %162 = vector.broadcast %cst_51 : f32 to vector<16x1xf32>
    %163 = arith.divf %161, %162 : vector<16x1xf32>
    %164 = vector.broadcast %163 : vector<16x1xf32> to vector<16x32xf32>
    %165 = arith.subf %157, %164 : vector<16x32xf32>
    %166 = arith.mulf %165, %165 : vector<16x32xf32>
    %cst_52 = arith.constant dense<0.000000e+00> : vector<16xf32>
    %167 = vector.multi_reduction <add>, %166, %cst_52 [1] : vector<16x32xf32> to vector<16xf32>
    %168 = vector.shape_cast %167 : vector<16xf32> to vector<16x1xf32>
    %cst_53 = arith.constant 3.200000e+01 : f32
    %169 = vector.broadcast %cst_53 : f32 to vector<16x1xf32>
    %170 = arith.divf %168, %169 : vector<16x1xf32>
    %171 = vector.broadcast %163 : vector<16x1xf32> to vector<16x32xf32>
    %172 = arith.subf %157, %171 : vector<16x32xf32>
    %cst_54 = arith.constant 9.99999974E-6 : f32
    %173 = vector.broadcast %cst_54 : f32 to vector<16x1xf32>
    %174 = arith.addf %170, %173 : vector<16x1xf32>
    %175 = math.rsqrt %174 : vector<16x1xf32>
    %176 = vector.broadcast %175 : vector<16x1xf32> to vector<16x32xf32>
    %177 = arith.mulf %172, %176 : vector<16x32xf32>
    %178 = vector.broadcast %158 : vector<1x32xf32> to vector<16x32xf32>
    %179 = arith.mulf %177, %178 : vector<16x32xf32>
    %180 = vector.broadcast %159 : vector<1x32xf32> to vector<16x32xf32>
    %181 = arith.addf %179, %180 : vector<16x32xf32>
    %c128 = arith.constant 128 : index
    %c0_55 = arith.constant 0 : index
    %182 = vector.load %arg1[%c128, %c0_55] : memref<256x32xf32, #tpu.memory_space<vmem>>, vector<32x32xf32>
    %cst_56 = arith.constant dense<0.000000e+00> : vector<16x32xf32>
    %183 = tpu.matmul %181, %182, %cst_56 {dimension_numbers = #tpu.dot_dimension_numbers<[1], [0], [0], [1], [0, 0, 1, 1], [], []>} : vector<16x32xf32>, vector<32x32xf32>, vector<16x32xf32> -> vector<16x32xf32>
    %184 = arith.addf %157, %183 : vector<16x32xf32>
    %185 = vector.extract_strided_slice %0 {offsets = [20, 0], sizes = [1, 32], strides = [1, 1]} : vector<48x32xf32> to vector<1x32xf32>
    %186 = vector.broadcast %185 : vector<1x32xf32> to vector<16x32xf32>
    %187 = arith.addf %184, %186 : vector<16x32xf32>
    %188 = vector.extract_strided_slice %0 {offsets = [28, 0], sizes = [1, 32], strides = [1, 1]} : vector<48x32xf32> to vector<1x32xf32>
    %189 = vector.extract_strided_slice %0 {offsets = [29, 0], sizes = [1, 32], strides = [1, 1]} : vector<48x32xf32> to vector<1x32xf32>
    %cst_57 = arith.constant dense<0.000000e+00> : vector<16xf32>
    %190 = vector.multi_reduction <add>, %187, %cst_57 [1] : vector<16x32xf32> to vector<16xf32>
    %191 = vector.shape_cast %190 : vector<16xf32> to vector<16x1xf32>
    %cst_58 = arith.constant 3.200000e+01 : f32
    %192 = vector.broadcast %cst_58 : f32 to vector<16x1xf32>
    %193 = arith.divf %191, %192 : vector<16x1xf32>
    %194 = vector.broadcast %193 : vector<16x1xf32> to vector<16x32xf32>
    %195 = arith.subf %187, %194 : vector<16x32xf32>
    %196 = arith.mulf %195, %195 : vector<16x32xf32>
    %cst_59 = arith.constant dense<0.000000e+00> : vector<16xf32>
    %197 = vector.multi_reduction <add>, %196, %cst_59 [1] : vector<16x32xf32> to vector<16xf32>
    %198 = vector.shape_cast %197 : vector<16xf32> to vector<16x1xf32>
    %cst_60 = arith.constant 3.200000e+01 : f32
    %199 = vector.broadcast %cst_60 : f32 to vector<16x1xf32>
    %200 = arith.divf %198, %199 : vector<16x1xf32>
    %201 = vector.broadcast %193 : vector<16x1xf32> to vector<16x32xf32>
    %202 = arith.subf %187, %201 : vector<16x32xf32>
    %cst_61 = arith.constant 9.99999974E-6 : f32
    %203 = vector.broadcast %cst_61 : f32 to vector<16x1xf32>
    %204 = arith.addf %200, %203 : vector<16x1xf32>
    %205 = math.rsqrt %204 : vector<16x1xf32>
    %206 = vector.broadcast %205 : vector<16x1xf32> to vector<16x32xf32>
    %207 = arith.mulf %202, %206 : vector<16x32xf32>
    %208 = vector.broadcast %188 : vector<1x32xf32> to vector<16x32xf32>
    %209 = arith.mulf %207, %208 : vector<16x32xf32>
    %210 = vector.broadcast %189 : vector<1x32xf32> to vector<16x32xf32>
    %211 = arith.addf %209, %210 : vector<16x32xf32>
    %c0_62 = arith.constant 0 : index
    %c0_63 = arith.constant 0 : index
    %212 = vector.load %arg2[%c0_62, %c0_63] : memref<33x64xf32, #tpu.memory_space<vmem>>, vector<32x64xf32>
    %cst_64 = arith.constant dense<0.000000e+00> : vector<16x64xf32>
    %213 = tpu.matmul %211, %212, %cst_64 {dimension_numbers = #tpu.dot_dimension_numbers<[1], [0], [0], [1], [0, 0, 1, 1], [], []>} : vector<16x32xf32>, vector<32x64xf32>, vector<16x64xf32> -> vector<16x64xf32>
    %c32_65 = arith.constant 32 : index
    %c0_66 = arith.constant 0 : index
    %214 = vector.load %arg2[%c32_65, %c0_66] : memref<33x64xf32, #tpu.memory_space<vmem>>, vector<1x64xf32>
    %215 = vector.broadcast %214 : vector<1x64xf32> to vector<16x64xf32>
    %216 = arith.addf %213, %215 : vector<16x64xf32>
    %cst_67 = arith.constant 5.000000e-01 : f32
    %217 = vector.broadcast %cst_67 : f32 to vector<16x64xf32>
    %218 = arith.mulf %217, %216 : vector<16x64xf32>
    %cst_68 = arith.constant 0.707106769 : f32
    %219 = vector.broadcast %cst_68 : f32 to vector<16x64xf32>
    %220 = arith.mulf %216, %219 : vector<16x64xf32>
    %221 = math.erf %220 : vector<16x64xf32>
    %cst_69 = arith.constant 1.000000e+00 : f32
    %222 = vector.broadcast %cst_69 : f32 to vector<16x64xf32>
    %223 = arith.addf %222, %221 : vector<16x64xf32>
    %224 = arith.mulf %218, %223 : vector<16x64xf32>
    %c192 = arith.constant 192 : index
    %c0_70 = arith.constant 0 : index
    %225 = vector.load %arg1[%c192, %c0_70] : memref<256x32xf32, #tpu.memory_space<vmem>>, vector<64x32xf32>
    %cst_71 = arith.constant dense<0.000000e+00> : vector<16x32xf32>
    %226 = tpu.matmul %224, %225, %cst_71 {dimension_numbers = #tpu.dot_dimension_numbers<[1], [0], [0], [1], [0, 0, 1, 1], [], []>} : vector<16x64xf32>, vector<64x32xf32>, vector<16x32xf32> -> vector<16x32xf32>
    %227 = arith.addf %187, %226 : vector<16x32xf32>
    %228 = vector.extract_strided_slice %0 {offsets = [23, 0], sizes = [1, 32], strides = [1, 1]} : vector<48x32xf32> to vector<1x32xf32>
    %229 = vector.broadcast %228 : vector<1x32xf32> to vector<16x32xf32>
    %230 = arith.addf %227, %229 : vector<16x32xf32>
    %c0_72 = arith.constant 0 : index
    %c0_73 = arith.constant 0 : index
    %231 = vector.load %arg4[%c0_72, %c0_73] : memref<16x32xf32, #tpu.memory_space<vmem>>, vector<16x32xf32>
    tpu.vector_store %arg4[%c0_72, %c0_73], %230 {strides = array<i32>} : memref<16x32xf32, #tpu.memory_space<vmem>>, vector<16x32xf32>,
    return
  }
}

</mosaic_0001>

<bundles_post_ra>
// kernel: mechanism_transformer_block.1
= control target key start
LH: loop header
LB: loop body
LE: loop exit
PB: predicated region body
PF: predicated region fallthrough
CT: control target
= control target key end

     0   :  { %vm30_vm0 = vcmask 261120   ;;  %s2786_s0 = inlined_call_operand.vmem [shape: f32[16,32], index: 0, kind: input, shape index: {}]   ;;  %s2787_s1 = inlined_call_operand.vmem [shape: f32[256,32], index: 1, kind: input, shape index: {}]   ;;  %s2788_s2 = inlined_call_operand.vmem [shape: f32[33,64], index: 2, kind: input, shape index: {}]   ;;  %s2789_s3 = inlined_call_operand.vmem [shape: f32[48,32], index: 3, kind: input, shape index: {}]   ;;  %s2790_s4 = inlined_call_operand.hbm [shape: f32[16,32], index: 4, kind: output, shape index: {0}]   ;;  %s2791_s5 = inlined_call_operand.vmem [shape: f32[16,1], index: 5, kind: output, shape index: {1}]  }
   0x1   :  { %v20_v0 = vld [vmem:[%s2789_s3] sm:$0xff]  ;;  %v21_v2 = vld [vmem:[%s2789_s3 + $0x8] sm:$0xff] }
   0x2   :  { %v26_v1 = vld [vmem:[%s2786_s0] sm:$0xff]  ;;  %v27_v4 = vld [vmem:[%s2786_s0 + $0x8] sm:$0xff] }
   0x3   :  { %v2427_v3 = vadd.f32 %v26_v1, %v20_v0 }
   0x4   :  { %11 = vsyncpa [#allocation3], 0  ;;  %v2432_v5 = vadd.f32 %v27_v4, %v21_v2  ;;  %v73_v18 = vld [vmem:[%s2787_s1 + $0x18] sm:$0xff]  ;;  %v72_v20 = vld [vmem:[%s2787_s1 + $0x10] sm:$0xff]  ;;  %v58_v32 = vlaneseq  ;;  %vm467_vm1 = vcmask 64512   ;;  %vm448_vm2 = vcmask 7168  }
   0x5   :  { %v31_v6 = vsel %vm30_vm0, %v2427_v3, 0.0  ;;  %v245_v19 = vld [vmem:[%s2787_s1 + $0x58] sm:$0xff]  ;;  %2129 = vmatprep.subr.mxu1 %v73_v18  ;;  %v244_v21 = vld [vmem:[%s2787_s1 + $0x50] sm:$0xff]  ;;  %v71_v22 = vld [vmem:[%s2787_s1 + $0x8] sm:$0xff]  ;;  %vm555_vm3 = vcmask 130048   ;;  %s2382_s17 = smov 120  }
   0x6   :  { %32 = vadd.xlane.f32.xlu0 %v31_v6  ;;  %v34_v7 = vsel %vm30_vm0, %v2432_v5, 0.0  ;;  %2151 = vmatprep.subr.mxu0 %v245_v19  ;;  %v243_v23 = vld [vmem:[%s2787_s1 + $0x48] sm:$0xff]  ;;  %v70_v24 = vld [vmem:[%s2787_s1] sm:$0xff]  ;;  %v162_v26 = vld [vmem:[%s2787_s1 + $0x38] sm:$0xff]  ;;  %v2469_v34 = vshrl.u32 %v58_v32, 7  ;;  %s2383_s19 = smov 112  }
   0x7   :  { %2130 = vmatpush3.msra.mxu1 %v73_v18  ;;  %2152 = vmatpush3.msra.mxu0 %v245_v19  ;;  %v242_v25 = vld [vmem:[%s2787_s1 + $0x40] sm:$0xff]  ;;  %v2475_v36 = vld [vmem:[%s2789_s3 + $0x18] sm:$0xff]  ;;  %v161_v48 = vld [vmem:[%s2787_s1 + $0x30] sm:$0xff]  ;;  %s2384_s20 = smov 104   ;;  %vm1878_vm4 = vcmask 523264  }
   0x8   :  { %2131 = vmatprep.subr.mxu1 %v72_v20  ;;  %2153 = vmatprep.subr.mxu0 %v244_v21  ;;  %v60_v35 = vsub.s32 0, %v2469_v34  ;;  %v66_v37 = vsub.s32 1, %v2469_v34  ;;  %v160_v49 = vld [vmem:[%s2787_s1 + $0x28] sm:$0xff]  ;;  %v159_v50 = vld [vmem:[%s2787_s1 + $0x20] sm:$0xff]  ;;  %v328_v51 = vld [vmem:[%s2787_s1 + $0xb8] sm:$0xff]  ;;  %v248_v55 = vsub.s32 2, %v2469_v34 }
   0x9   :  { %2132 = vmatpush3.msra.mxu1 %v72_v20  ;;  %2154 = vmatpush3.msra.mxu0 %v244_v21  ;;  %v327_v52 = vld [vmem:[%s2787_s1 + $0xb0] sm:$0xff]  ;;  %v326_v53 = vld [vmem:[%s2787_s1 + $0xa8] sm:$0xff]  ;;  %v325_v54 = vld [vmem:[%s2787_s1 + $0xa0] sm:$0xff]  ;;  %v331_v6 = vsub.s32 5, %v2469_v34 }
   0xa   :  { %35 = vadd.xlane.f32.xlu0 %v34_v7  ;;  %2133 = vmatprep.subr.mxu1 %v71_v22  ;;  %v61_v38 = vrot.slane %v2475_v36, %v60_v35  ;;  %v67_v41 = vrot.slane %v2475_v36, %v66_v37  ;;  %v2515_v56 = vld [vmem:[%s2789_s3 + $0x10] sm:$0xff] }
   0xb   :  { %2134 = vmatpush3.msra.mxu1 %v71_v22  ;;  %2155 = vmatprep.subr.mxu0 %v243_v23  ;;  %v77_v57 = vrot.slane %v2515_v56, %v60_v35  ;;  %v249_v58 = vrot.slane %v2515_v56, %v248_v55 }
   0xc   :  { %2135 = vmatprep.subr.mxu1 %v70_v24  ;;  %2156 = vmatpush3.msra.mxu0 %v243_v23 }
   0xd   :  { %2136 = vmatpush3.msra.mxu1 %v70_v24  ;;  %2157 = vmatprep.subr.mxu0 %v242_v25 }
   0xe   :  { %2140 = vmatprep.subr.mxu1 %v162_v26  ;;  %2158 = vmatpush3.msra.mxu0 %v242_v25 }
  0x8f   :  { %v33_v8 = vpop.xlane.xlu0 %32 }
  0x90   :  { %v38_v9 = vmul.f32 0.03125, %v33_v8  ;;  %v332_v8 = vrot.slane %v2515_v56, %v331_v6 }
  0x92   :  { %v40_v10 = vsub.f32 %v2427_v3, %v38_v9 }
  0x93   :  { %v36_v11 = vpop.xlane.xlu0 %35 }
  0x94   :  { %v39_v12 = vmul.f32 0.03125, %v36_v11  ;;  %v42_v13 = vmul.f32 %v40_v10, %v40_v10 }
  0x96   :  { %v41_v14 = vsub.f32 %v2432_v5, %v39_v12  ;;  %v44_v15 = vsel %vm30_vm0, %v42_v13, 0.0 }
  0x97   :  { %45 = vadd.xlane.f32.xlu1 %v44_v15 }
  0x98   :  { %v43_v16 = vmul.f32 %v41_v14, %v41_v14 }
  0x9a   :  { %v47_v17 = vsel %vm30_vm0, %v43_v16, 0.0  ;;  %v420_v16 = vsub.s32 6, %v2469_v34 }
  0x9b   :  { %48 = vadd.xlane.f32.xlu1 %v47_v17 }
  0x9c   :  { %v421_v20 = vrot.slane %v2515_v56, %v420_v16 }
 0x120   :  { %v46_v27 = vpop.xlane.xlu1 %45 }
 0x121   :  { %v50_v28 = vmul.f32 0.03125, %v46_v27 }
 0x123   :  { %v52_v29 = vadd.f32 1e-05, %v50_v28 }
 0x124   :  { %v49_v30 = vpop.xlane.xlu1 %48 }
 0x125   :  { %2299 = vrsqrt.f32 %v52_v29  ;;  %v51_v31 = vmul.f32 0.03125, %v49_v30  ;;  %v2381_v30 = vmov 0  }
 0x126   :  { %2297 = vset.pattern.permute.xlu0 %v2381_v30  ;;  %2298 = vset.pattern.permute.xlu1 %v2381_v30 }
 0x127   :  { %v53_v33 = vadd.f32 1e-05, %v51_v31  ;;  %v433_v31 = vrot.slane %v2475_v36, %v420_v16 }
 0x129   :  { %2301 = vrsqrt.f32 %v53_v33 }
 0x132   :  { %v2300_v39 = vpop.eup %2299 }
 0x133   :  { %v56_v40 = vmul.f32 %v2300_v39, %v40_v10 }
 0x135   :  { %v62_v42 = vmul.f32 %v61_v38, %v56_v40 }
 0x136   :  { %v2302_v43 = vpop.eup %2301 }
 0x137   :  { %v68_v44 = vadd.f32 %v67_v41, %v62_v42  ;;  %v57_v45 = vmul.f32 %v2302_v43, %v41_v14 }
 0x139   :  { %2137 = vmatprep.mubr.msk.f32.mxu1 %vm30_vm0, %v68_v44  ;;  %2159 = vmatprep.mubr.msk.f32.mxu0 %vm30_vm0, %v68_v44  ;;  %v63_v46 = vmul.f32 %v61_v38, %v57_v45 }
 0x13b   :  { %v69_v47 = vadd.f32 %v67_v41, %v63_v46 }
 0x13d   :  { %2138 = vmatmul.mubr.msk.f32.vlgmr.msra.gmra.mxu1 %vm30_vm0, %v69_v47  ;;  %2160 = vmatmul.mubr.msk.f32.vlgmr.msra.gmra.mxu0 %vm30_vm0, %v69_v47 }
 0x13e   :  { %2141 = vmatpush3.msra.mxu1 %v162_v26  ;;  %2148 = vmatprep.mubr.msk.f32.mxu1 %vm30_vm0, %v68_v44 }
 0x13f   :  { %2142 = vmatprep.subr.mxu1 %v161_v48 }
 0x140   :  { %2143 = vmatpush3.msra.mxu1 %v161_v48 }
 0x141   :  { %2144 = vmatprep.subr.mxu1 %v160_v49 }
 0x142   :  { %2145 = vmatpush3.msra.mxu1 %v160_v49  ;;  %v166_v49 = vrot.slane %v2515_v56, %v66_v37 }
 0x143   :  { %2146 = vmatprep.subr.mxu1 %v159_v50 }
 0x144   :  { %2147 = vmatpush3.msra.mxu1 %v159_v50 }
 0x145   :  { %2149 = vmatmul.mubr.msk.f32.vlgmr.msra.gmra.mxu1 %vm30_vm0, %v69_v47  ;;  %2162 = vmatprep.subr.mxu1 %v328_v51 }
 0x146   :  { %2163 = vmatpush3.msra.mxu1 %v328_v51  ;;  %2170 = vmatprep.mubr.msk.f32.mxu1 %vm30_vm0, %v68_v44 }
 0x147   :  { %2164 = vmatprep.subr.mxu1 %v327_v52 }
 0x148   :  { %2165 = vmatpush3.msra.mxu1 %v327_v52 }
 0x149   :  { %2166 = vmatprep.subr.mxu1 %v326_v53 }
 0x14a   :  { %2167 = vmatpush3.msra.mxu1 %v326_v53 }
 0x14b   :  { %2168 = vmatprep.subr.mxu1 %v325_v54 }
 0x14c   :  { %2169 = vmatpush3.msra.mxu1 %v325_v54 }
 0x14d   :  { %2171 = vmatmul.mubr.msk.f32.vlgmr.msra.gmra.mxu1 %vm30_vm0, %v69_v47 }
 0x1fd   :  { %v2139_v59 = vpop.f32.mrf.mxu1  ;;  %v2161_v60 = vpop.f32.mrf.mxu0 }
 0x1fe   :  { %v2521_v61 = vadd.f32 %v2139_v59, %v77_v57  ;;  %v2523_v62 = vadd.f32 %v2161_v60, %v249_v58  ;;  %v2578_v60 = vld [vmem:[%s2789_s3 + $0x20] sm:$0xff] }
 0x1ff   :  { %v150_v63 = vpop.f32.mrf.mxu1  ;;  %v316_v0 = vpop.f32.mrf.mxu0 }
 0x200   :  { %v151_v1 = vadd.f32 %v150_v63, %v77_v57  ;;  %v2525_v2 = vadd.f32 %v316_v0, %v249_v58  ;;  %2180 = vmatprep.subr.mxu1 %v2523_v62  ;;  %v2566_v37 = vmul.f32 0.35355338, %v2521_v61  ;;  %v2573_v58 = vld [vmem:[%s2789_s3 + $0x28] sm:$0xff] }
 0x201   :  { %2181 = vmatpush3.msra.mxu1 %v2523_v62 }
 0x202   :  { %v2529_v4 = vmul.f32 0.35355338, %v151_v1  ;;  %2182 = vmatprep.subr.mxu1 %v2525_v2 }
 0x203   :  { %2183 = vmatpush3.msra.mxu1 %v2525_v2 }
 0x204   :  { %2177 = vmatprep.mubr.msk.f32.mxu0 %vm467_vm1, %v2529_v4 }
 0x205   :  { %v2150_v7 = vpop.f32.mrf.mxu1 }
 0x206   :  { %v239_v50 = vadd.f32 %v2150_v7, %v166_v49 }
 0x207   :  { %v233_v9 = vpop.f32.mrf.mxu1 }
 0x208   :  { %v234_v52 = vadd.f32 %v233_v9, %v166_v49 }
 0x20d   :  { %v2172_v10 = vpop.f32.mrf.mxu1 }
 0x20e   :  { %v405_v11 = vadd.f32 %v2172_v10, %v332_v8 }
 0x20f   :  { %v399_v12 = vpop.f32.mrf.mxu1 }
 0x210   :  { %v411_v13 = vmul.f32 0.70710677, %v405_v11  ;;  %v400_v14 = vadd.f32 %v399_v12, %v332_v8  ;;  %v409_v18 = vmul.f32 0.5, %v405_v11 }
 0x212   :  { %2303 = verf.f32 %v411_v13  ;;  %v410_v15 = vmul.f32 0.70710677, %v400_v14  ;;  %v408_v22 = vmul.f32 0.5, %v400_v14 }
 0x214   :  { %2305 = verf.f32 %v410_v15 }
 0x21f   :  { %v2304_v17 = vpop.eup %2303 }
 0x220   :  { %v415_v19 = vadd.f32 1.0, %v2304_v17 }
 0x221   :  { %v2306_v21 = vpop.eup %2305 }
 0x222   :  { %v417_v23 = vmul.f32 %v415_v19, %v409_v18  ;;  %v414_v24 = vadd.f32 1.0, %v2306_v21 }
 0x224   :  { %v423_v25 = vmul.f32 %v421_v20, %v417_v23  ;;  %v416_v26 = vmul.f32 %v414_v24, %v408_v22 }
 0x226   :  { %v427_v27 = vsel %vm30_vm0, %v423_v25, 0.0  ;;  %v422_v28 = vmul.f32 %v421_v20, %v416_v26 }
 0x227   :  { %428 = vadd.xlane.f32.xlu0 %v427_v27 }
 0x228   :  { %v424_v29 = vsel %vm30_vm0, %v422_v28, 0.0  ;;  %v659_v28 = vld [vmem:[%s2787_s1 + $0x60] sm:$0xff] }
 0x229   :  { %425 = vadd.xlane.f32.xlu1 %v424_v29 }
 0x2b0   :  { %v429_v32 = vpop.xlane.xlu0 %428 }
 0x2b1   :  { %v435_v33 = vadd.f32 %v433_v31, %v429_v32 }
 0x2b2   :  { %v426_v35 = vpop.xlane.xlu1 %425 }
 0x2b3   :  { %v1999_v38 = vmul.f32 -1.442695, %v435_v33  ;;  %v434_v39 = vadd.f32 %v433_v31, %v426_v35 }
 0x2b5   :  { %2307 = vpow2.f32 %v1999_v38  ;;  %v1998_v40 = vmul.f32 -1.442695, %v434_v39 }
 0x2b7   :  { %2309 = vpow2.f32 %v1998_v40 }
 0x2c2   :  { %v2308_v41 = vpop.eup %2307 }
 0x2c3   :  { %v443_v42 = vadd.f32 1.0, %v2308_v41 }
 0x2c4   :  { %v2310_v43 = vpop.eup %2309 }
 0x2c5   :  { %2311 = vrcp.f32 %v443_v42  ;;  %v442_v44 = vadd.f32 1.0, %v2310_v43 }
 0x2c7   :  { %2313 = vrcp.f32 %v442_v44 }
 0x2d2   :  { %v2312_v45 = vpop.eup %2311 }
 0x2d3   :  { %450 = vst.msk [vmem:[%s2791_s5 + $0x8] sm:$0xff] %vm448_vm2, %v2312_v45  ;;  %v454_v46 = vadd.f32 1.0, %v2312_v45 }
 0x2d4   :  { %v2314_v47 = vpop.eup %2313 }
 0x2d5   :  { %449 = vst.msk [vmem:[%s2791_s5] sm:$0xff] %vm448_vm2, %v2314_v47  ;;  %462 = vperm.xlu0 %2297, %v454_v46   ;;  %v453_v48 = vadd.f32 1.0, %v2314_v47 }
 0x2d7   :  { %457 = vperm.xlu1 %2298, %v453_v48  }
 0x350   :  { %v463_v51 = vpop.permute.xlu0 %462 }
 0x351   :  { %v2553_v53 = vmul.f32 %v463_v51, %v239_v50 }
 0x352   :  { %v458_v54 = vpop.permute.xlu1 %457 }
 0x353   :  { %v2555_v57 = vmul.f32 %v458_v54, %v234_v52  ;;  %2173 = vmatprep.subr.msk.mxu0 %vm467_vm1, %v2553_v53 }
 0x354   :  { %2174 = vmatpush3.xpose.msk.msra.mxu0 %vm467_vm1, %v2553_v53 }
 0x355   :  { %2175 = vmatprep.subr.msk.mxu0 %vm467_vm1, %v2555_v57 }
 0x358   :  { %2176 = vmatpush3.xpose.msk.msra.mxu0 %vm467_vm1, %v2555_v57 }
 0x35b   :  { %2178 = vmatmul.mubr.msk.f32.vlgmr.msra.gmra.mxu0 %vm467_vm1, %v2566_v37 }
 0x41b   :  { %v2179_v59 = vpop.f32.mrf.mxu0 }
 0x41c   :  { %v552_v63 = vadd.f32 %v2179_v59, %v2573_v58 }
 0x41d   :  { %v546_v0 = vpop.f32.mrf.mxu0 }
 0x41e   :  { %v547_v61 = vadd.f32 %v546_v0, %v2578_v60  ;;  %v559_v1 = vsel %vm555_vm3, %v552_v63, -inf }
 0x41f   :  { %560 = vmax.xlane.f32.xlu0 %v559_v1 }
 0x420   :  { %v556_v7 = vsel %vm555_vm3, %v547_v61, -inf }
 0x421   :  { %557 = vmax.xlane.f32.xlu1 %v556_v7 }
 0x432   :  { %666 = vrot.lane.b32.xlu1 %v2553_v53, %s2382_s17 }
 0x435   :  { %664 = vrot.lane.b32.xlu0 %v2555_v57, %s2382_s17 }
 0x436   :  { %660 = vrot.lane.b32.xlu1 %v2529_v4, %s2382_s17 }
 0x4a8   :  { %v561_v8 = vpop.xlane.xlu0 %560 }
 0x4a9   :  { %v563_v9 = vsub.f32 %v552_v63, %v561_v8 }
 0x4aa   :  { %v558_v10 = vpop.xlane.xlu1 %557 }
 0x4ab   :  { %v566_v11 = vmul.f32 1.442695, %v563_v9  ;;  %v562_v12 = vsub.f32 %v547_v61, %v558_v10 }
 0x4ac   :  { %v665_v26 = vpop.permute.xlu0 %664 }
 0x4ad   :  { %2315 = vpow2.f32 %v566_v11  ;;  %v564_v13 = vmul.f32 1.442695, %v562_v12 }
 0x4ae   :  { %v667_v14 = vpop.permute.xlu1 %666 }
 0x4af   :  { %2317 = vpow2.f32 %v564_v13  ;;  %2187 = vmatprep.subr.msk.mxu1 %vm467_vm1, %v667_v14 }
 0x4b2   :  { %v661_v19 = vpop.permute.xlu1 %660 }
 0x4ba   :  { %v2316_v15 = vpop.eup %2315 }
 0x4bb   :  { %v571_v16 = vsel %vm555_vm3, %v2316_v15, 0.0 }
 0x4bc   :  { %v2318_v17 = vpop.eup %2317  ;;  %572 = vadd.xlane.f32.xlu1 %v571_v16 }
 0x4bd   :  { %v568_v18 = vsel %vm555_vm3, %v2318_v17, 0.0 }
 0x4c0   :  { %569 = vadd.xlane.f32.xlu1 %v568_v18 }
 0x4d1   :  { %662 = vrot.lane.b32.xlu1 %v2566_v37, %s2382_s17 }
 0x545   :  { %v573_v20 = vpop.xlane.xlu1 %572 }
 0x546   :  { %2319 = vrcp.f32 %v573_v20 }
 0x549   :  { %v570_v21 = vpop.xlane.xlu1 %569 }
 0x54a   :  { %2321 = vrcp.f32 %v570_v21 }
 0x54d   :  { %v663_v27 = vpop.permute.xlu1 %662 }
 0x553   :  { %v2320_v22 = vpop.eup %2319 }
 0x554   :  { %v577_v25 = vmul.f32 %v2320_v22, %v2316_v15 }
 0x557   :  { %v2322_v23 = vpop.eup %2321 }
 0x558   :  { %v576_v24 = vmul.f32 %v2322_v23, %v2318_v17 }
 0x55a   :  { %2184 = vmatprep.mubr.msk.f32.mxu1 %vm555_vm3, %v576_v24 }
 0x55b   :  { %2185 = vmatmul.mubr.msk.f32.vlgmr.msra.gmra.mxu1 %vm555_vm3, %v577_v25 }
 0x55c   :  { %2188 = vmatpush3.xpose.msk.msra.mxu1 %vm467_vm1, %v667_v14  ;;  %2191 = vmatprep.mubr.msk.f32.mxu1 %vm467_vm1, %v661_v19 }
 0x55d   :  { %2189 = vmatprep.subr.msk.mxu1 %vm467_vm1, %v665_v26 }
 0x560   :  { %2190 = vmatpush3.xpose.msk.msra.mxu1 %vm467_vm1, %v665_v26 }
 0x561   :  { %2206 = vmatprep.subr.mxu1 %v659_v28 }
 0x563   :  { %2192 = vmatmul.mubr.msk.f32.vlgmr.msra.gmra.mxu1 %vm467_vm1, %v663_v27 }
 0x564   :  { %2207 = vmatpush3.msra.mxu1 %v659_v28 }
 0x61b   :  { %v2186_v29 = vpop.f32.mrf.mxu1 }
 0x61d   :  { %v650_v30 = vpop.f32.mrf.mxu1 }
 0x61e   :  { %2208 = vmatprep.mubr.msk.f32.mxu1 %vm467_vm1, %v650_v30 }
 0x61f   :  { %2209 = vmatmul.mubr.msk.f32.vlgmr.msra.gmra.mxu1 %vm467_vm1, %v2186_v29 }
 0x623   :  { %v2193_v31 = vpop.f32.mrf.mxu1 }
 0x624   :  { %v748_v32 = vadd.f32 %v2193_v31, %v2573_v58 }
 0x625   :  { %v742_v33 = vpop.f32.mrf.mxu1 }
 0x626   :  { %v743_v35 = vadd.f32 %v742_v33, %v2578_v60  ;;  %v754_v38 = vsel %vm555_vm3, %v748_v32, -inf }
 0x627   :  { %755 = vmax.xlane.f32.xlu0 %v754_v38 }
 0x628   :  { %v751_v39 = vsel %vm555_vm3, %v743_v35, -inf }
 0x629   :  { %752 = vmax.xlane.f32.xlu1 %v751_v39 }
 0x63d   :  { %777 = vrot.lane.b32.xlu0 %v2523_v62, %s2382_s17 }
 0x641   :  { %1029 = vrot.lane.b32.xlu0 %v2555_v57, %s2383_s19 }
 0x645   :  { %1027 = vrot.lane.b32.xlu0 %v2566_v37, %s2383_s19 }
 0x649   :  { %1313 = vrot.lane.b32.xlu0 %v2555_v57, %s2384_s20  ;;  %v862_v57 = vld [vmem:[%s2787_s1 + $0x68] sm:$0xff] }
 0x64d   :  { %1311 = vrot.lane.b32.xlu0 %v2566_v37, %s2384_s20 }
 0x6b0   :  { %v756_v40 = vpop.xlane.xlu0 %755 }
 0x6b1   :  { %v758_v41 = vsub.f32 %v748_v32, %v756_v40 }
 0x6b2   :  { %v753_v42 = vpop.xlane.xlu1 %752 }
 0x6b3   :  { %v761_v43 = vmul.f32 1.442695, %v758_v41  ;;  %v757_v44 = vsub.f32 %v743_v35, %v753_v42 }
 0x6b4   :  { %v778_v45 = vpop.permute.xlu0 %777 }
 0x6b5   :  { %2323 = vpow2.f32 %v761_v43  ;;  %v759_v46 = vmul.f32 1.442695, %v757_v44  ;;  %2194 = vmatprep.subr.mxu0 %v778_v45 }
 0x6b6   :  { %2195 = vmatpush3.msra.mxu0 %v778_v45 }
 0x6b7   :  { %2325 = vpow2.f32 %v759_v46 }
 0x6b8   :  { %v1030_v1 = vpop.permute.xlu0 %1029 }
 0x6bc   :  { %v1028_v9 = vpop.permute.xlu0 %1027 }
 0x6c0   :  { %v1314_v11 = vpop.permute.xlu0 %1313 }
 0x6c2   :  { %v2324_v47 = vpop.eup %2323 }
 0x6c3   :  { %v766_v48 = vsel %vm555_vm3, %v2324_v47, 0.0 }
 0x6c4   :  { %v2326_v49 = vpop.eup %2325  ;;  %767 = vadd.xlane.f32.xlu1 %v766_v48  ;;  %v1312_v12 = vpop.permute.xlu0 %1311 }
 0x6c5   :  { %v763_v50 = vsel %vm555_vm3, %v2326_v49, 0.0 }
 0x6c8   :  { %764 = vadd.xlane.f32.xlu1 %v763_v50 }
 0x6d9   :  { %775 = vrot.lane.b32.xlu1 %v2525_v2, %s2382_s17 }
 0x6dd   :  { %1031 = vrot.lane.b32.xlu1 %v2553_v53, %s2383_s19 }
 0x6e1   :  { %1025 = vrot.lane.b32.xlu1 %v2529_v4, %s2383_s19 }
 0x6e5   :  { %1315 = vrot.lane.b32.xlu1 %v2553_v53, %s2384_s20 }
 0x6e9   :  { %1309 = vrot.lane.b32.xlu1 %v2529_v4, %s2384_s20 }
 0x74d   :  { %v768_v51 = vpop.xlane.xlu1 %767 }
 0x74e   :  { %2327 = vrcp.f32 %v768_v51 }
 0x751   :  { %v765_v52 = vpop.xlane.xlu1 %764 }
 0x752   :  { %2329 = vrcp.f32 %v765_v52 }
 0x755   :  { %v776_v54 = vpop.permute.xlu1 %775 }
 0x756   :  { %2196 = vmatprep.subr.mxu0 %v776_v54 }
 0x757   :  { %2197 = vmatpush3.msra.mxu0 %v776_v54 }
 0x758   :  { %2201 = vmatprep.subr.mxu0 %v862_v57 }
 0x759   :  { %v1032_v4 = vpop.permute.xlu1 %1031 }
 0x75b   :  { %v2328_v37 = vpop.eup %2327 }
 0x75c   :  { %v772_v0 = vmul.f32 %v2328_v37, %v2324_v47 }
 0x75d   :  { %v1026_v53 = vpop.permute.xlu1 %1025 }
 0x75f   :  { %v2330_v59 = vpop.eup %2329 }
 0x760   :  { %v771_v63 = vmul.f32 %v2330_v59, %v2326_v49  ;;  %v1225_v59 = vld [vmem:[%s2787_s1 + $0x70] sm:$0xff] }
 0x761   :  { %v1316_v8 = vpop.permute.xlu1 %1315 }
 0x762   :  { %2198 = vmatprep.mubr.msk.f32.mxu0 %vm555_vm3, %v771_v63  ;;  %v2210_v63 = vpop.f32.mrf.mxu1 }
 0x763   :  { %2199 = vmatmul.mubr.msk.f32.vlgmr.msra.gmra.mxu0 %vm555_vm3, %v772_v0 }
 0x764   :  { %2202 = vmatpush3.msra.mxu0 %v862_v57  ;;  %v1016_v0 = vpop.f32.mrf.mxu1 }
 0x765   :  { %2211 = vmatprep.subr.msk.mxu0 %vm467_vm1, %v1032_v4  ;;  %v1310_v10 = vpop.permute.xlu1 %1309 }
 0x823   :  { %v2200_v61 = vpop.f32.mrf.mxu0 }
 0x825   :  { %v853_v7 = vpop.f32.mrf.mxu0 }
 0x826   :  { %2203 = vmatprep.mubr.msk.f32.mxu0 %vm467_vm1, %v853_v7 }
 0x827   :  { %2204 = vmatmul.mubr.msk.f32.vlgmr.msra.gmra.mxu0 %vm467_vm1, %v2200_v61 }
 0x828   :  { %2212 = vmatpush3.xpose.msk.msra.mxu0 %vm467_vm1, %v1032_v4  ;;  %2215 = vmatprep.mubr.msk.f32.mxu0 %vm467_vm1, %v1026_v53 }
 0x829   :  { %2213 = vmatprep.subr.msk.mxu0 %vm467_vm1, %v1030_v1 }
 0x82c   :  { %2214 = vmatpush3.xpose.msk.msra.mxu0 %vm467_vm1, %v1030_v1 }
 0x82d   :  { %2230 = vmatprep.subr.msk.mxu0 %vm467_vm1, %v1316_v8 }
 0x82f   :  { %2216 = vmatmul.mubr.msk.f32.vlgmr.msra.gmra.mxu0 %vm467_vm1, %v1028_v9 }
 0x830   :  { %2231 = vmatpush3.xpose.msk.msra.mxu0 %vm467_vm1, %v1316_v8  ;;  %2234 = vmatprep.mubr.msk.f32.mxu0 %vm467_vm1, %v1310_v10 }
 0x831   :  { %2232 = vmatprep.subr.msk.mxu0 %vm467_vm1, %v1314_v11 }
 0x834   :  { %2233 = vmatpush3.xpose.msk.msra.mxu0 %vm467_vm1, %v1314_v11  ;;  %v1509_v11 = vld [vmem:[%s2787_s1 + $0x78] sm:$0xff] }
 0x837   :  { %2235 = vmatmul.mubr.msk.f32.vlgmr.msra.gmra.mxu0 %vm467_vm1, %v1312_v12 }
 0x8e7   :  { %v2652_v13 = vpop.f32.mrf.mxu0 }
 0x8e8   :  { %v1022_v12 = vadd.f32 %v2210_v63, %v2652_v13 }
 0x8e9   :  { %v2654_v14 = vpop.f32.mrf.mxu0 }
 0x8ef   :  { %v2217_v15 = vpop.f32.mrf.mxu0 }
 0x8f0   :  { %v1113_v16 = vadd.f32 %v2217_v15, %v2573_v58 }
 0x8f1   :  { %v1107_v17 = vpop.f32.mrf.mxu0 }
 0x8f2   :  { %v1108_v18 = vadd.f32 %v1107_v17, %v2578_v60  ;;  %v1119_v19 = vsel %vm555_vm3, %v1113_v16, -inf }
 0x8f3   :  { %1120 = vmax.xlane.f32.xlu0 %v1119_v19 }
 0x8f4   :  { %v1116_v20 = vsel %vm555_vm3, %v1108_v18, -inf }
 0x8f5   :  { %1117 = vmax.xlane.f32.xlu1 %v1116_v20 }
 0x8f7   :  { %v2236_v31 = vpop.f32.mrf.mxu0 }
 0x8f8   :  { %v1397_v35 = vadd.f32 %v2236_v31, %v2573_v58 }
 0x8f9   :  { %v1391_v32 = vpop.f32.mrf.mxu0 }
 0x8fa   :  { %v1392_v33 = vadd.f32 %v1391_v32, %v2578_v60  ;;  %v1403_v39 = vsel %vm555_vm3, %v1397_v35, -inf }
 0x8fc   :  { %v1400_v38 = vsel %vm555_vm3, %v1392_v33, -inf }
 0x97c   :  { %v1121_v21 = vpop.xlane.xlu0 %1120 }
 0x97d   :  { %v1123_v22 = vsub.f32 %v1113_v16, %v1121_v21  ;;  %v1017_v16 = vadd.f32 %v1016_v0, %v2654_v14 }
 0x97e   :  { %v1118_v23 = vpop.xlane.xlu1 %1117 }
 0x97f   :  { %v1126_v24 = vmul.f32 1.442695, %v1123_v22  ;;  %v1122_v25 = vsub.f32 %v1108_v18, %v1118_v23  ;;  %v1597_v22 = vsub.s32 3, %v2469_v34 }
 0x981   :  { %2331 = vpow2.f32 %v1126_v24  ;;  %v1124_v26 = vmul.f32 1.442695, %v1122_v25  ;;  %v1598_v25 = vrot.slane %v2515_v56, %v1597_v22  ;;  %v1636_v63 = vrot.slane %v2475_v36, %v1597_v22 }
 0x983   :  { %2333 = vpow2.f32 %v1124_v26 }
 0x98e   :  { %v2332_v27 = vpop.eup %2331 }
 0x98f   :  { %v1131_v28 = vsel %vm555_vm3, %v2332_v27, 0.0 }
 0x990   :  { %v2334_v29 = vpop.eup %2333  ;;  %1132 = vadd.xlane.f32.xlu1 %v1131_v28 }
 0x991   :  { %v1128_v30 = vsel %vm555_vm3, %v2334_v29, 0.0 }
 0x992   :  { %1129 = vadd.xlane.f32.xlu0 %v1128_v30 }
 0x9a1   :  { %1138 = vrot.lane.b32.xlu1 %v2525_v2, %s2383_s19 }
 0x9a8   :  { %1140 = vrot.lane.b32.xlu0 %v2523_v62, %s2383_s19 }
 0x9c5   :  { %1401 = vmax.xlane.f32.xlu1 %v1400_v38 }
 0x9c7   :  { %1404 = vmax.xlane.f32.xlu0 %v1403_v39 }
 0xa19   :  { %v1133_v40 = vpop.xlane.xlu1 %1132 }
 0xa1a   :  { %2335 = vrcp.f32 %v1133_v40 }
 0xa1b   :  { %v1130_v41 = vpop.xlane.xlu0 %1129 }
 0xa1c   :  { %2337 = vrcp.f32 %v1130_v41 }
 0xa1d   :  { %v1139_v43 = vpop.permute.xlu1 %1138 }
 0xa1f   :  { %v1141_v42 = vpop.permute.xlu0 %1140 }
 0xa20   :  { %2218 = vmatprep.subr.mxu1 %v1141_v42 }
 0xa21   :  { %2219 = vmatpush3.msra.mxu1 %v1141_v42 }
 0xa22   :  { %2220 = vmatprep.subr.mxu1 %v1139_v43 }
 0xa23   :  { %2221 = vmatpush3.msra.mxu1 %v1139_v43  ;;  %v1642_v43 = vld [vmem:[%s2787_s1 + $0x98] sm:$0xff] }
 0xa24   :  { %2225 = vmatprep.subr.mxu1 %v1225_v59  ;;  %2249 = vmatprep.subr.mxu0 %v1642_v43 }
 0xa25   :  { %2250 = vmatpush3.msra.mxu0 %v1642_v43  ;;  %v1877_v43 = vld [vmem:[%s2787_s1 + $0xf8] sm:$0xff] }
 0xa27   :  { %v2336_v44 = vpop.eup %2335 }
 0xa28   :  { %v1137_v58 = vmul.f32 %v2336_v44, %v2332_v27  ;;  %v1641_v44 = vld [vmem:[%s2787_s1 + $0x90] sm:$0xff] }
 0xa29   :  { %v2338_v60 = vpop.eup %2337  ;;  %2251 = vmatprep.subr.mxu0 %v1641_v44 }
 0xa2a   :  { %v1136_v45 = vmul.f32 %v2338_v60, %v2334_v29  ;;  %v1640_v60 = vld [vmem:[%s2787_s1 + $0x88] sm:$0xff]  ;;  %2252 = vmatpush3.msra.mxu0 %v1641_v44  ;;  %v1874_v44 = vld [vmem:[%s2787_s1 + $0xe0] sm:$0xff] }
 0xa2b   :  { %2253 = vmatprep.subr.mxu0 %v1640_v60 }
 0xa2c   :  { %2222 = vmatprep.mubr.msk.f32.mxu1 %vm555_vm3, %v1136_v45  ;;  %v1639_v45 = vld [vmem:[%s2787_s1 + $0x80] sm:$0xff]  ;;  %2254 = vmatpush3.msra.mxu0 %v1640_v60  ;;  %v1873_v60 = vld [vmem:[%s2787_s1 + $0xd8] sm:$0xff] }
 0xa2d   :  { %2223 = vmatmul.mubr.msk.f32.vlgmr.msra.gmra.mxu1 %vm555_vm3, %v1137_v58  ;;  %2255 = vmatprep.subr.mxu0 %v1639_v45 }
 0xa2e   :  { %2226 = vmatpush3.msra.mxu1 %v1225_v59  ;;  %2256 = vmatpush3.msra.mxu0 %v1639_v45  ;;  %v1872_v45 = vld [vmem:[%s2787_s1 + $0xd0] sm:$0xff] }
 0xa2f   :  { %2271 = vmatprep.subr.mxu0 %v1877_v43 }
 0xa4e   :  { %v1402_v46 = vpop.xlane.xlu1 %1401 }
 0xa4f   :  { %v1406_v47 = vsub.f32 %v1392_v33, %v1402_v46 }
 0xa50   :  { %v1405_v48 = vpop.xlane.xlu0 %1404 }
 0xa51   :  { %v1408_v49 = vmul.f32 1.442695, %v1406_v47  ;;  %v1407_v50 = vsub.f32 %v1397_v35, %v1405_v48 }
 0xa53   :  { %2339 = vpow2.f32 %v1408_v49  ;;  %v1410_v51 = vmul.f32 1.442695, %v1407_v50 }
 0xa55   :  { %2341 = vpow2.f32 %v1410_v51 }
 0xa60   :  { %v2340_v52 = vpop.eup %2339 }
 0xa61   :  { %v1412_v54 = vsel %vm555_vm3, %v2340_v52, 0.0 }
 0xa62   :  { %v2342_v57 = vpop.eup %2341  ;;  %1413 = vadd.xlane.f32.xlu0 %v1412_v54 }
 0xa63   :  { %v1415_v37 = vsel %vm555_vm3, %v2342_v57, 0.0 }
 0xa64   :  { %1416 = vadd.xlane.f32.xlu1 %v1415_v37 }
 0xa75   :  { %1422 = vrot.lane.b32.xlu1 %v2525_v2, %s2384_s20 }
 0xa78   :  { %1424 = vrot.lane.b32.xlu0 %v2523_v62, %s2384_s20 }
 0xaeb   :  { %v1414_v4 = vpop.xlane.xlu0 %1413 }
 0xaec   :  { %2343 = vrcp.f32 %v1414_v4 }
 0xaed   :  { %v2224_v53 = vpop.f32.mrf.mxu1  ;;  %v1417_v61 = vpop.xlane.xlu1 %1416 }
 0xaee   :  { %2345 = vrcp.f32 %v1417_v61  ;;  %v1728_v61 = vsub.s32 4, %v2469_v34 }
 0xaef   :  { %v1216_v1 = vpop.f32.mrf.mxu1  ;;  %v1425_v7 = vpop.permute.xlu0 %1424 }
 0xaf0   :  { %2227 = vmatprep.mubr.msk.f32.mxu1 %vm467_vm1, %v1216_v1  ;;  %2237 = vmatprep.subr.mxu1 %v1425_v7  ;;  %v1729_v1 = vrot.slane %v2515_v56, %v1728_v61 }
 0xaf1   :  { %2228 = vmatmul.mubr.msk.f32.vlgmr.msra.gmra.mxu1 %vm467_vm1, %v2224_v53  ;;  %v1423_v8 = vpop.permute.xlu1 %1422 }
 0xaf2   :  { %2238 = vmatpush3.msra.mxu1 %v1425_v7 }
 0xaf3   :  { %2239 = vmatprep.subr.mxu1 %v1423_v8 }
 0xaf4   :  { %2240 = vmatpush3.msra.mxu1 %v1423_v8 }
 0xaf5   :  { %2244 = vmatprep.subr.mxu1 %v1509_v11 }
 0xaf9   :  { %v2344_v2 = vpop.eup %2343 }
 0xafa   :  { %v1420_v62 = vmul.f32 %v2344_v2, %v2340_v52  ;;  %v1630_v52 = vrot.slane %v2475_v36, %v248_v55 }
 0xafb   :  { %v2346_v9 = vpop.eup %2345 }
 0xafc   :  { %2241 = vmatprep.mubr.msk.f32.mxu1 %vm555_vm3, %v1420_v62  ;;  %v1421_v10 = vmul.f32 %v2346_v9, %v2342_v57 }
 0xafe   :  { %2242 = vmatmul.mubr.msk.f32.vlgmr.msra.gmra.mxu1 %vm555_vm3, %v1421_v10 }
 0xaff   :  { %2245 = vmatpush3.msra.mxu1 %v1509_v11 }
 0xbb1   :  { %v2229_v15 = vpop.f32.mrf.mxu1 }
 0xbb2   :  { %v1308_v17 = vadd.f32 %v2229_v15, %v1022_v12 }
 0xbb3   :  { %v1298_v18 = vpop.f32.mrf.mxu1 }
 0xbb4   :  { %v1307_v19 = vadd.f32 %v1298_v18, %v1017_v16 }
 0xbbe   :  { %v2243_v20 = vpop.f32.mrf.mxu1 }
 0xbc0   :  { %v1500_v21 = vpop.f32.mrf.mxu1 }
 0xbc1   :  { %2246 = vmatprep.mubr.msk.f32.mxu1 %vm467_vm1, %v1500_v21 }
 0xbc2   :  { %2247 = vmatmul.mubr.msk.f32.vlgmr.msra.gmra.mxu1 %vm467_vm1, %v2243_v20 }
 0xc82   :  { %v2248_v23 = vpop.f32.mrf.mxu1 }
 0xc83   :  { %v1592_v24 = vadd.f32 %v2248_v23, %v1308_v17 }
 0xc84   :  { %v1582_v26 = vpop.f32.mrf.mxu1 }
 0xc85   :  { %v1594_v13 = vadd.f32 %v1592_v24, %v2432_v5  ;;  %v1591_v27 = vadd.f32 %v1582_v26, %v1307_v19  ;;  %v1773_v24 = vld [vmem:[%s2788_s2 + $0x18] sm:$0xff]  ;;  %v1771_v26 = vld [vmem:[%s2788_s2 + $0x8] sm:$0xff] }
 0xc86   :  { %2260 = vmatprep.subr.mxu1 %v1773_v24 }
 0xc87   :  { %v1600_v14 = vadd.f32 %v1598_v25, %v1594_v13  ;;  %v1593_v28 = vadd.f32 %v1591_v27, %v2427_v3  ;;  %2261 = vmatpush3.msra.mxu1 %v1773_v24  ;;  %v1770_v13 = vld [vmem:[%s2788_s2] sm:$0xff] }
 0xc89   :  { %v1599_v29 = vadd.f32 %v1598_v25, %v1593_v28  ;;  %v1604_v30 = vsel %vm30_vm0, %v1600_v14, 0.0  ;;  %v1772_v25 = vld [vmem:[%s2788_s2 + $0x10] sm:$0xff] }
 0xc8a   :  { %1605 = vadd.xlane.f32.xlu0 %v1604_v30  ;;  %2262 = vmatprep.subr.mxu1 %v1772_v25 }
 0xc8b   :  { %v1601_v31 = vsel %vm30_vm0, %v1599_v29, 0.0  ;;  %2263 = vmatpush3.msra.mxu1 %v1772_v25 }
 0xc8c   :  { %1602 = vadd.xlane.f32.xlu1 %v1601_v31  ;;  %2264 = vmatprep.subr.mxu1 %v1771_v26 }
 0xc8d   :  { %2265 = vmatpush3.msra.mxu1 %v1771_v26 }
 0xc8e   :  { %2266 = vmatprep.subr.mxu1 %v1770_v13 }
 0xc8f   :  { %2267 = vmatpush3.msra.mxu1 %v1770_v13 }
 0xd13   :  { %v1606_v32 = vpop.xlane.xlu0 %1605 }
 0xd14   :  { %v1608_v33 = vmul.f32 0.03125, %v1606_v32  ;;  %v1761_v32 = vrot.slane %v2475_v36, %v1728_v61 }
 0xd15   :  { %v1603_v35 = vpop.xlane.xlu1 %1602 }
 0xd16   :  { %v1610_v38 = vsub.f32 %v1600_v14, %v1608_v33  ;;  %v1607_v39 = vmul.f32 0.03125, %v1603_v35  ;;  %v1767_v35 = vrot.slane %v2475_v36, %v331_v6  ;;  %v1876_v36 = vld [vmem:[%s2787_s1 + $0xf0] sm:$0xff]  ;;  %v1875_v6 = vld [vmem:[%s2787_s1 + $0xe8] sm:$0xff] }
 0xd18   :  { %v1609_v40 = vsub.f32 %v1599_v29, %v1607_v39  ;;  %v1612_v41 = vmul.f32 %v1610_v38, %v1610_v38 }
 0xd1a   :  { %v1616_v5 = vsel %vm30_vm0, %v1612_v41, 0.0  ;;  %v1611_v42 = vmul.f32 %v1609_v40, %v1609_v40 }
 0xd1b   :  { %1617 = vadd.xlane.f32.xlu1 %v1616_v5 }
 0xd1c   :  { %v1613_v3 = vsel %vm30_vm0, %v1611_v42, 0.0 }
 0xd1d   :  { %1614 = vadd.xlane.f32.xlu0 %v1613_v3 }
 0xda4   :  { %v1618_v58 = vpop.xlane.xlu1 %1617 }
 0xda5   :  { %v1620_v46 = vmul.f32 0.03125, %v1618_v58  ;;  %v1871_v58 = vld [vmem:[%s2787_s1 + $0xc8] sm:$0xff] }
 0xda6   :  { %v1615_v47 = vpop.xlane.xlu0 %1614 }
 0xda7   :  { %v1622_v48 = vadd.f32 1e-05, %v1620_v46  ;;  %v1619_v49 = vmul.f32 0.03125, %v1615_v47  ;;  %v1870_v46 = vld [vmem:[%s2787_s1 + $0xc0] sm:$0xff]  ;;  %s2385_s1 = smov [#allocation2]  }
 0xda8   :  { %v2034_v47 = vld [vmem:[%s2788_s2 + $0x20] ss:$0 sm:$0xff]  ;;  %s1975_s2 = sshll.u32 %s2385_s1, 4  ;;  %s1976_s2 = int_to_ptr.vmem [resolvable:$true] %s1975_s2 }
 0xda9   :  { %2347 = vrsqrt.f32 %v1622_v48  ;;  %v1621_v50 = vadd.f32 1e-05, %v1619_v49  ;;  %s2359_s7 = scalar_lea.vmem %s1976_s2, 256  ;;  %p2364_p1 = scmp.lt.s32.totalorder %s1976_s2, %s1976_s2 }
 0xdaa   :  { %p2360_p0 = scmp.ne.s32.totalorder %s1976_s2, %s2359_s7  ;;  %p2365_p2 = scmp.lt.s32.totalorder %s2359_s7, %s2359_s7 }
 0xdab   :  { %2349 = vrsqrt.f32 %v1621_v50 }
 0xdac   :  { %p2366_p3 = por %p2365_p2, %p2364_p1 }
 0xdae   :  { %p2367_p4 = pnand %p2366_p3, %p2360_p0 }
 0xdb6   :  { %v2348_v51 = vpop.eup %2347 }
 0xdb7   :  { %v1626_v54 = vmul.f32 %v2348_v51, %v1610_v38 }
 0xdb8   :  { %v2350_v57 = vpop.eup %2349 }
 0xdb9   :  { %v1625_v37 = vmul.f32 %v2350_v57, %v1609_v40  ;;  %v1632_v59 = vmul.f32 %v1630_v52, %v1626_v54 }
 0xdbb   :  { %v1631_v0 = vmul.f32 %v1630_v52, %v1625_v37  ;;  %v1638_v53 = vadd.f32 %v1636_v63, %v1632_v59 }
 0xdbd   :  { %v1637_v4 = vadd.f32 %v1636_v63, %v1631_v0 }
 0xdbf   :  { %2257 = vmatprep.mubr.msk.f32.mxu0 %vm30_vm0, %v1637_v4 }
 0xdc0   :  { %2258 = vmatmul.mubr.msk.f32.vlgmr.msra.gmra.mxu0 %vm30_vm0, %v1638_v53 }
 0xdc1   :  { %2272 = vmatpush3.msra.mxu0 %v1877_v43 }
 0xdc2   :  { %2273 = vmatprep.subr.mxu0 %v1876_v36 }
 0xdc3   :  { %2274 = vmatpush3.msra.mxu0 %v1876_v36 }
 0xdc4   :  { %2275 = vmatprep.subr.mxu0 %v1875_v6 }
 0xdc5   :  { %2276 = vmatpush3.msra.mxu0 %v1875_v6 }
 0xdc6   :  { %2277 = vmatprep.subr.mxu0 %v1874_v44 }
 0xdc7   :  { %2278 = vmatpush3.msra.mxu0 %v1874_v44 }
 0xdc8   :  { %2279 = vmatprep.subr.mxu0 %v1873_v60 }
 0xdc9   :  { %2280 = vmatpush3.msra.mxu0 %v1873_v60 }
 0xdca   :  { %2281 = vmatprep.subr.mxu0 %v1872_v45 }
 0xdcb   :  { %2282 = vmatpush3.msra.mxu0 %v1872_v45 }
 0xdcc   :  { %2283 = vmatprep.subr.mxu0 %v1871_v58 }
 0xdcd   :  { %2284 = vmatpush3.msra.mxu0 %v1871_v58 }
 0xdce   :  { %2285 = vmatprep.subr.mxu0 %v1870_v46 }
 0xdcf   :  { %2286 = vmatpush3.msra.mxu0 %v1870_v46 }
 0xe80   :  { %v2259_v7 = vpop.f32.mrf.mxu0 }
 0xe81   :  { %v1725_v8 = vadd.f32 %v2259_v7, %v1600_v14 }
 0xe82   :  { %v1715_v55 = vpop.f32.mrf.mxu0 }
 0xe83   :  { %v2720_v2 = vadd.f32 %v1729_v1, %v1725_v8  ;;  %v1724_v62 = vadd.f32 %v1715_v55, %v1599_v29 }
 0xe85   :  { %v2722_v9 = vadd.f32 %v1729_v1, %v1724_v62  ;;  %v1735_v10 = vsel %vm30_vm0, %v2720_v2, 0.0  ;;  %v1964_v1 = vsub.s32 7, %v2469_v34 }
 0xe86   :  { %1736 = vadd.xlane.f32.xlu1 %v1735_v10 }
 0xe87   :  { %v1732_v11 = vsel %vm30_vm0, %v2722_v9, 0.0  ;;  %v1965_v7 = vrot.slane %v2515_v56, %v1964_v1 }
 0xe88   :  { %1733 = vadd.xlane.f32.xlu0 %v1732_v11 }
 0xf0f   :  { %v1737_v12 = vpop.xlane.xlu1 %1736 }
 0xf10   :  { %v1739_v15 = vmul.f32 0.03125, %v1737_v12 }
 0xf11   :  { %v1734_v16 = vpop.xlane.xlu0 %1733 }
 0xf12   :  { %v1741_v17 = vsub.f32 %v2720_v2, %v1739_v15  ;;  %v1738_v18 = vmul.f32 0.03125, %v1734_v16 }
 0xf14   :  { %v1740_v19 = vsub.f32 %v2722_v9, %v1738_v18  ;;  %v1743_v20 = vmul.f32 %v1741_v17, %v1741_v17 }
 0xf16   :  { %v1747_v21 = vsel %vm30_vm0, %v1743_v20, 0.0  ;;  %v1742_v22 = vmul.f32 %v1740_v19, %v1740_v19 }
 0xf17   :  { %1748 = vadd.xlane.f32.xlu1 %v1747_v21 }
 0xf18   :  { %v1744_v23 = vsel %vm30_vm0, %v1742_v22, 0.0 }
 0xf19   :  { %1745 = vadd.xlane.f32.xlu0 %v1744_v23 }
 0xfa0   :  { %v1749_v27 = vpop.xlane.xlu1 %1748 }
 0xfa1   :  { %v1751_v14 = vmul.f32 0.03125, %v1749_v27 }
 0xfa2   :  { %v1746_v28 = vpop.xlane.xlu0 %1745 }
 0xfa3   :  { %v1753_v29 = vadd.f32 1e-05, %v1751_v14  ;;  %v1750_v30 = vmul.f32 0.03125, %v1746_v28 }
 0xfa5   :  { %2351 = vrsqrt.f32 %v1753_v29  ;;  %v1752_v31 = vadd.f32 1e-05, %v1750_v30 }
 0xfa7   :  { %2353 = vrsqrt.f32 %v1752_v31 }
 0xfb2   :  { %v2352_v33 = vpop.eup %2351 }
 0xfb3   :  { %v1757_v38 = vmul.f32 %v2352_v33, %v1741_v17 }
 0xfb4   :  { %v2354_v39 = vpop.eup %2353 }
 0xfb5   :  { %v1756_v40 = vmul.f32 %v2354_v39, %v1740_v19  ;;  %v1763_v41 = vmul.f32 %v1761_v32, %v1757_v38 }
 0xfb7   :  { %v1762_v5 = vmul.f32 %v1761_v32, %v1756_v40  ;;  %v1769_v42 = vadd.f32 %v1767_v35, %v1763_v41 }
 0xfb9   :  { %v1768_v3 = vadd.f32 %v1767_v35, %v1762_v5 }
 0xfbb   :  { %2268 = vmatprep.mubr.msk.f32.mxu1 %vm30_vm0, %v1768_v3 }
 0xfbc   :  { %2269 = vmatmul.mubr.msk.f32.vlgmr.msra.gmra.mxu1 %vm30_vm0, %v1769_v42 }
0x107c   :  { %v2270_v48 = vpop.f32.mrf.mxu1 }
0x107d   :  { %v1857_v49 = vadd.f32 %v2270_v48, %v2034_v47 }
0x107e   :  { %v1851_v50 = vpop.f32.mrf.mxu1 }
0x107f   :  { %v1863_v51 = vmul.f32 0.70710677, %v1857_v49  ;;  %v1852_v52 = vadd.f32 %v2034_v47, %v1851_v50  ;;  %v1861_v4 = vmul.f32 0.5, %v1857_v49 }
0x1081   :  { %2355 = verf.f32 %v1863_v51  ;;  %v1862_v54 = vmul.f32 0.70710677, %v1852_v52  ;;  %v1860_v63 = vmul.f32 0.5, %v1852_v52 }
0x1083   :  { %2357 = verf.f32 %v1862_v54 }
0x108e   :  { %v2356_v57 = vpop.eup %2355 }
0x108f   :  { %v1867_v59 = vadd.f32 1.0, %v2356_v57 }
0x1090   :  { %v2358_v37 = vpop.eup %2357 }
0x1091   :  { %v1866_v0 = vadd.f32 1.0, %v2358_v37  ;;  %v1869_v61 = vmul.f32 %v1867_v59, %v1861_v4 }
0x1093   :  { %v1868_v53 = vmul.f32 %v1866_v0, %v1860_v63 }
0x1095   :  { %2287 = vmatprep.mubr.msk.f32.mxu0 %vm1878_vm4, %v1868_v53 }
0x1096   :  { %2288 = vmatmul.mubr.msk.f32.vlgmr.msra.gmra.mxu0 %vm1878_vm4, %v1869_v61 }
0x1156   :  { %v2289_v8 = vpop.f32.mrf.mxu0 }
0x1157   :  { %v1961_v55 = vadd.f32 %v2289_v8, %v2720_v2 }
0x1158   :  { %v1951_v62 = vpop.f32.mrf.mxu0 }
0x1159   :  { %v1967_v10 = vadd.f32 %v1965_v7, %v1961_v55  ;;  %v1960_v11 = vadd.f32 %v1951_v62, %v2722_v9 }
0x115b   :  { %1969 = vst.msk [vmem:[#allocation2 + $0x8] sm:$0xff] %vm30_vm0, %v1967_v10  ;;  %v1966_v12 = vadd.f32 %v1965_v7, %v1960_v11 }
0x115d   :  { %1968 = vst.msk [vmem:[#allocation2] sm:$0xff] %vm30_vm0, %v1966_v12 }
0x115e   :  { %2370 = shalt.err (!%p2367_p4)
}
0x115f   :  { %s2386_s8 = smov 128   ;;  %s2387_s9 = smov 8  }
0x1160   :  { %1981 = dma.vmem_to_hbm [thread:$0]  %s1976_s2, 256, %s2790_s4, [#allocation3], %s2386_s8, %s2386_s8, %s2387_s9  }
0x1161   :  { %2379 = dma.done.wait [#allocation3], 256  }
0x1162   :  { %2380 = vsyncadd [#allocation3], 4294967040 }
0x1163   :  { %1989 = vsyncpa [#allocation3], 1 }

</bundles_post_ra>
